<compile_context>
chip_gen: v5e
topology: v5e:2x2
jax: 0.10.0
libtpu: 0.0.40
codegen_flags: <defaults>
</compile_context>

<pallas_src>
import jax
import jax.numpy as jnp
from jax.experimental import pallas as pl
from jax.experimental.pallas import tpu as pltpu

# ----------------------- synthetic "config" -----------------------
BATCH = 2
SEQ = 8                      # n_ctx
VOCAB = 16
EMB_DIM = 8                  # token_emb_dim
PAD_ID = 0
DENSENET_KERNELS = [[3, 5], [3, 5]]     # depth=2, width=2 (odd kernels -> same padding)
FIRST_NUM_FILTERS = 8
NUM_FILTERS = 8
LAST_NUM_FILTERS = 16        # densenet_last_num_filters == dsa_input_dim
DSA_NUM_ATTENTIONS = 2
DSA_DIM = 8
DSA_R = 3
FC_HIDDEN = 16
LABEL_SIZE = 3
LN_EPS = 1e-5
LEAKY_SLOPE = 0.01

_DSA_LAST = DSA_NUM_ATTENTIONS * DSA_DIM
_MAX_PAD = (max(k for ks in DENSENET_KERNELS for k in ks) - 1) // 2


# ----------------------- in-kernel helpers (trace-time) -----------------------

def _shift_matrix(n, off):
    """(n, n) 0/1 matrix M with (M @ x)[t] = x[t + off] (zero outside range)."""
    r = jax.lax.broadcasted_iota(jnp.int32, (n, n), 0)
    c = jax.lax.broadcasted_iota(jnp.int32, (n, n), 1)
    return (c == r + off).astype(jnp.float32)


def _leaky(v):
    return jnp.where(v >= 0.0, v, LEAKY_SLOPE * v)


def _layer_norm(v, gamma, beta):
    """PyTorch LayerNorm over the last axis (biased variance, eps=1e-5)."""
    mu = jnp.mean(v, axis=-1, keepdims=True)
    var = jnp.mean((v - mu) * (v - mu), axis=-1, keepdims=True)
    return (v - mu) * jax.lax.rsqrt(var + LN_EPS) * gamma + beta


# ----------------------- the single fused kernel -----------------------

def _fused_forward_kernel(x_ref, mrow_ref, mcol_ref,
                          w00_ref, b00_ref, w01_ref, b01_ref,
                          w10_ref, b10_ref, w11_ref, b11_ref,
                          wl_ref, bl_ref, gd_ref, bd_ref,
                          wdsa_ref, bdsa_ref, ga_ref, ba_ref,
                          w1_ref, b1_ref, gh_ref, bh_ref,
                          w2_ref, b2_ref,
                          o_ref):
    S = SEQ
    x = x_ref[0]            # (S, EMB_DIM)  embedding rows (pad rows are zero)
    mrow = mrow_ref[0]      # (1, S)        1.0 = valid token, 0.0 = padding
    mcol = mcol_ref[0]      # (S, 1)

    # Shift matrices for all conv offsets, built once per grid step.
    shifts = {off: _shift_matrix(S, off)
              for off in range(-_MAX_PAD, _MAX_PAD + 1) if off != 0}

    def conv_same(inp, w_ref, b_ref, ksize):
        """Same-padded Conv1d: y[t] = sum_k x[t+k-p] @ W_k + b.

        inp: (S, Cin) value; w_ref: (ksize*Cin, Cout) ref; b_ref: (1, Cout)."""
        cin = inp.shape[1]
        p = (ksize - 1) // 2
        acc = None
        for k in range(ksize):
            off = k - p
            wk = w_ref[k * cin:(k + 1) * cin, :]            # (Cin, Cout)
            xk = inp if off == 0 else jnp.dot(
                shifts[off], inp, preferred_element_type=jnp.float32)
            term = jnp.dot(xk, wk, preferred_element_type=jnp.float32)
            acc = term if acc is None else acc + term
        return acc + b_ref[...]

    # ---------------- DenseNet ----------------
    dn_w = ((w00_ref, w01_ref), (w10_ref, w11_ref))
    dn_b = ((b00_ref, b01_ref), (b10_ref, b11_ref))

    merge = []
    for j in range(len(DENSENET_KERNELS[0])):
        conv_results = []
        for i, kss in enumerate(DENSENET_KERNELS):
            if i == 0:
                conv_in = x
            elif len(conv_results) == 1:
                conv_in = conv_results[0]
            else:
                conv_in = jnp.concatenate(conv_results, axis=-1)
            y = conv_same(conv_in, dn_w[i][j], dn_b[i][j], kss[j])
            y = _leaky(y * mcol)                    # mask BEFORE activation
            conv_results.append(y)
        merge.append(conv_results[-1])

    cat = jnp.concatenate([x] + merge, axis=-1)     # (S, EMB + width*NUM)
    # conv_last is a 1x1 conv == linear layer
    d = jnp.dot(cat, wl_ref[...], preferred_element_type=jnp.float32) + bl_ref[...]
    d = jnp.maximum(d * mcol, 0.0)                  # mask then ReLU
    d = _layer_norm(d, gd_ref[...], bd_ref[...])    # (S, LAST_NUM_FILTERS)

    # ---------------- DSA ----------------
    # Both head projections batched into a single matmul.
    proj = jnp.dot(d, wdsa_ref[...], preferred_element_type=jnp.float32) + bdsa_ref[...]
    proj = _leaky(proj)                             # (S, heads * DSA_DIM)
    pad_row = mrow == 0.0                           # (1, S) bool

    z_heads = []
    for h in range(DSA_NUM_ATTENTIONS):
        p = proj[:, h * DSA_DIM:(h + 1) * DSA_DIM]  # (S, DSA_DIM)
        q = jnp.zeros((1, S), jnp.float32)
        z = jnp.zeros((1, DSA_DIM), jnp.float32)
        for _ in range(DSA_R):                      # dsa_r static -> unrolled
            # masked_fill(-1e20) at padding.  (Numerically-stable form of the
            # reference's multiplicative -1e20 mask, which overflows to inf
            # and NaNs the softmax after a few iterations.)
            qm = jnp.where(pad_row, -1e20, q)
            mx = jnp.max(qm, axis=-1, keepdims=True)
            e = jnp.exp(qm - mx)
            a = e / jnp.sum(e, axis=-1, keepdims=True)       # softmax over seq
            a = a * mrow                                     # as in reference
            s = jnp.dot(a, p, preferred_element_type=jnp.float32)   # (1, D)
            z = jnp.tanh(s)
            # q += x . z, contracting the D axis of both operands so p is
            # consumed in its native (S, D) layout (no explicit transpose).
            q = q + jax.lax.dot_general(
                z, p, (((1,), (1,)), ((), ())),
                preferred_element_type=jnp.float32)          # (1, S)
        z_heads.append(z)

    zc = jnp.concatenate(z_heads, axis=-1)          # (1, heads * DSA_DIM)
    zc = _layer_norm(zc, ga_ref[...], ba_ref[...])

    # ---------------- classifier head ----------------
    hdn = jnp.dot(zc, w1_ref[...], preferred_element_type=jnp.float32) + b1_ref[...]
    hdn = _layer_norm(hdn, gh_ref[...], bh_ref[...])
    logits = jnp.dot(hdn, w2_ref[...], preferred_element_type=jnp.float32) + b2_ref[...]

    mx = jnp.max(logits, axis=-1, keepdims=True)
    e = jnp.exp(logits - mx)
    o_ref[0] = e / jnp.sum(e, axis=-1, keepdims=True)        # (1, LABEL_SIZE)


# ----------------------- parameters (deterministic, packed for the kernel) -----------------------

def init_params(key):
    keys = iter(jax.random.split(key, 64))

    def nrm(shape, scale=0.1):
        return scale * jax.random.normal(next(keys), shape, jnp.float32)

    emb = nrm((VOCAB, EMB_DIM), 0.5)
    emb = emb.at[PAD_ID].set(0.0)                   # padding_idx row is zero

    def pack_conv(w_oik, b_o):
        """PyTorch (Cout, Cin, K) conv weight -> (K*Cin, Cout) matmul weight."""
        cout, cin, k = w_oik.shape
        w2 = jnp.transpose(w_oik, (2, 1, 0)).reshape(k * cin, cout)
        return w2.astype(jnp.float32), b_o.reshape(1, cout).astype(jnp.float32)

    width = len(DENSENET_KERNELS[0])
    flat = []
    # densenet convs, ordered [layer i][branch j]
    for i, kss in enumerate(DENSENET_KERNELS):
        if i == 0:
            cin, cout = EMB_DIM, FIRST_NUM_FILTERS
        else:
            cin, cout = FIRST_NUM_FILTERS + NUM_FILTERS * (i - 1), NUM_FILTERS
        for k in kss:
            w, b = pack_conv(nrm((cout, cin, k)), nrm((cout,)))
            flat.extend([w, b])

    # conv_last (1x1)
    cin_last = EMB_DIM + NUM_FILTERS * width
    wl, bl = pack_conv(nrm((LAST_NUM_FILTERS, cin_last, 1)), nrm((LAST_NUM_FILTERS,)))
    flat.extend([wl, bl])

    # layernorm_densenet
    flat.extend([jnp.ones((1, LAST_NUM_FILTERS), jnp.float32),
                 jnp.zeros((1, LAST_NUM_FILTERS), jnp.float32)])

    # DSA head projections batched into one weight (in, heads*DSA_DIM)
    dsa_ws = [nrm((LAST_NUM_FILTERS, DSA_DIM)) for _ in range(DSA_NUM_ATTENTIONS)]
    dsa_bs = [nrm((DSA_DIM,)) for _ in range(DSA_NUM_ATTENTIONS)]
    flat.extend([jnp.concatenate(dsa_ws, axis=1),
                 jnp.concatenate(dsa_bs).reshape(1, _DSA_LAST)])

    # layernorm_dsa
    flat.extend([jnp.ones((1, _DSA_LAST), jnp.float32),
                 jnp.zeros((1, _DSA_LAST), jnp.float32)])

    # fc_hidden + layernorm_fc_hidden + fc
    flat.extend([nrm((_DSA_LAST, FC_HIDDEN)), nrm((FC_HIDDEN,)).reshape(1, FC_HIDDEN)])
    flat.extend([jnp.ones((1, FC_HIDDEN), jnp.float32),
                 jnp.zeros((1, FC_HIDDEN), jnp.float32)])
    flat.extend([nrm((FC_HIDDEN, LABEL_SIZE)), nrm((LABEL_SIZE,)).reshape(1, LABEL_SIZE)])

    return {"embedding": emb, "flat": flat}


# ----------------------- wrapper -----------------------

def model_forward(params, token_ids):
    B, S = token_ids.shape
    mask_f = (token_ids != PAD_ID).astype(jnp.float32)        # torch.sign(abs(x))
    # Embedding lookup as a plain gather (no one-hot matmul).
    x_emb = jnp.take(params["embedding"], token_ids, axis=0)  # (B, S, EMB_DIM)
    mrow = mask_f.reshape(B, 1, S)
    mcol = mask_f.reshape(B, S, 1)

    flat = params["flat"]

    def full_spec(a):
        n = a.ndim
        return pl.BlockSpec(a.shape, lambda b, _n=n: (0,) * _n)  # resident in VMEM

    in_specs = [
        pl.BlockSpec((1, S, EMB_DIM), lambda b: (b, 0, 0)),
        pl.BlockSpec((1, 1, S), lambda b: (b, 0, 0)),
        pl.BlockSpec((1, S, 1), lambda b: (b, 0, 0)),
    ] + [full_spec(a) for a in flat]

    out = pl.pallas_call(
        _fused_forward_kernel,
        out_shape=jax.ShapeDtypeStruct((B, 1, LABEL_SIZE), jnp.float32),
        grid_spec=pltpu.PrefetchScalarGridSpec(
            num_scalar_prefetch=0,
            grid=(B,),
            in_specs=in_specs,
            out_specs=pl.BlockSpec((1, 1, LABEL_SIZE), lambda b: (b, 0, 0)),
        ),
        compiler_params=pltpu.CompilerParams(
            dimension_semantics=("parallel",)),   # one batch element per TC on v7x
    )(x_emb, mrow, mcol, *flat)
    return out.reshape(B, LABEL_SIZE)


if __name__ == "__main__":
    key = jax.random.PRNGKey(0)
    pkey, xkey = jax.random.split(key)
    params = init_params(pkey)

    token_ids = jax.random.randint(xkey, (BATCH, SEQ), 1, VOCAB, dtype=jnp.int32)
    token_ids = token_ids.at[:, SEQ - 2:].set(PAD_ID)   # trailing padding positions

    fwd = jax.jit(model_forward)
    out = fwd(params, token_ids)
    out = jax.block_until_ready(out)

    assert out.shape == (BATCH, LABEL_SIZE), out.shape
    assert bool(jnp.all(jnp.isfinite(out)))
    # rows of the softmax output sum to 1
    assert bool(jnp.allclose(jnp.sum(out, axis=-1), 1.0, atol=1e-5))
    print("KERNEL_OK")
</pallas_src>

<mosaic_0001>
module attributes {stable_mosaic.version = 11 : i64} {
  func.func @_fused_forward_kernel(%arg0: i32, %arg1: memref<1x8x8xf32, #tpu.memory_space<vmem>>, %arg2: memref<1x1x8xf32, #tpu.memory_space<vmem>>, %arg3: memref<1x8x1xf32, #tpu.memory_space<vmem>>, %arg4: memref<24x8xf32, #tpu.memory_space<vmem>>, %arg5: memref<1x8xf32, #tpu.memory_space<vmem>>, %arg6: memref<40x8xf32, #tpu.memory_space<vmem>>, %arg7: memref<1x8xf32, #tpu.memory_space<vmem>>, %arg8: memref<24x8xf32, #tpu.memory_space<vmem>>, %arg9: memref<1x8xf32, #tpu.memory_space<vmem>>, %arg10: memref<40x8xf32, #tpu.memory_space<vmem>>, %arg11: memref<1x8xf32, #tpu.memory_space<vmem>>, %arg12: memref<24x16xf32, #tpu.memory_space<vmem>>, %arg13: memref<1x16xf32, #tpu.memory_space<vmem>>, %arg14: memref<1x16xf32, #tpu.memory_space<vmem>>, %arg15: memref<1x16xf32, #tpu.memory_space<vmem>>, %arg16: memref<16x16xf32, #tpu.memory_space<vmem>>, %arg17: memref<1x16xf32, #tpu.memory_space<vmem>>, %arg18: memref<1x16xf32, #tpu.memory_space<vmem>>, %arg19: memref<1x16xf32, #tpu.memory_space<vmem>>, %arg20: memref<16x16xf32, #tpu.memory_space<vmem>>, %arg21: memref<1x16xf32, #tpu.memory_space<vmem>>, %arg22: memref<1x16xf32, #tpu.memory_space<vmem>>, %arg23: memref<1x16xf32, #tpu.memory_space<vmem>>, %arg24: memref<16x3xf32, #tpu.memory_space<vmem>>, %arg25: memref<1x3xf32, #tpu.memory_space<vmem>>, %arg26: memref<1x1x3xf32, #tpu.memory_space<vmem>>) attributes {dimension_semantics = [#tpu.dimension_semantics<parallel>], iteration_bounds = array<i64: 2>, scalar_prefetch = 0 : i64, scratch_operands = 0 : i64, tpu.core_type = #tpu.core_type<tc>, window_params = [{transform_indices = @transform_0, window_bounds = array<i64: 1, 8, 8>}, {transform_indices = @transform_1, window_bounds = array<i64: 1, 1, 8>}, {transform_indices = @transform_2, window_bounds = array<i64: 1, 8, 1>}, {pipeline_mode = #tpu.pipeline_mode<synchronous>, transform_indices = @transform_3, window_bounds = array<i64: 24, 8>}, {pipeline_mode = #tpu.pipeline_mode<synchronous>, transform_indices = @transform_4, window_bounds = array<i64: 1, 8>}, {pipeline_mode = #tpu.pipeline_mode<synchronous>, transform_indices = @transform_5, window_bounds = array<i64: 40, 8>}, {pipeline_mode = #tpu.pipeline_mode<synchronous>, transform_indices = @transform_6, window_bounds = array<i64: 1, 8>}, {pipeline_mode = #tpu.pipeline_mode<synchronous>, transform_indices = @transform_7, window_bounds = array<i64: 24, 8>}, {pipeline_mode = #tpu.pipeline_mode<synchronous>, transform_indices = @transform_8, window_bounds = array<i64: 1, 8>}, {pipeline_mode = #tpu.pipeline_mode<synchronous>, transform_indices = @transform_9, window_bounds = array<i64: 40, 8>}, {pipeline_mode = #tpu.pipeline_mode<synchronous>, transform_indices = @transform_10, window_bounds = array<i64: 1, 8>}, {pipeline_mode = #tpu.pipeline_mode<synchronous>, transform_indices = @transform_11, window_bounds = array<i64: 24, 16>}, {pipeline_mode = #tpu.pipeline_mode<synchronous>, transform_indices = @transform_12, window_bounds = array<i64: 1, 16>}, {pipeline_mode = #tpu.pipeline_mode<synchronous>, transform_indices = @transform_13, window_bounds = array<i64: 1, 16>}, {pipeline_mode = #tpu.pipeline_mode<synchronous>, transform_indices = @transform_14, window_bounds = array<i64: 1, 16>}, {pipeline_mode = #tpu.pipeline_mode<synchronous>, transform_indices = @transform_15, window_bounds = array<i64: 16, 16>}, {pipeline_mode = #tpu.pipeline_mode<synchronous>, transform_indices = @transform_16, window_bounds = array<i64: 1, 16>}, {pipeline_mode = #tpu.pipeline_mode<synchronous>, transform_indices = @transform_17, window_bounds = array<i64: 1, 16>}, {pipeline_mode = #tpu.pipeline_mode<synchronous>, transform_indices = @transform_18, window_bounds = array<i64: 1, 16>}, {pipeline_mode = #tpu.pipeline_mode<synchronous>, transform_indices = @transform_19, window_bounds = array<i64: 16, 16>}, {pipeline_mode = #tpu.pipeline_mode<synchronous>, transform_indices = @transform_20, window_bounds = array<i64: 1, 16>}, {pipeline_mode = #tpu.pipeline_mode<synchronous>, transform_indices = @transform_21, window_bounds = array<i64: 1, 16>}, {pipeline_mode = #tpu.pipeline_mode<synchronous>, transform_indices = @transform_22, window_bounds = array<i64: 1, 16>}, {pipeline_mode = #tpu.pipeline_mode<synchronous>, transform_indices = @transform_23, window_bounds = array<i64: 16, 3>}, {pipeline_mode = #tpu.pipeline_mode<synchronous>, transform_indices = @transform_24, window_bounds = array<i64: 1, 3>}, {transform_indices = @transform_25, window_bounds = array<i64: 1, 1, 3>}]} {
    %c0 = arith.constant 0 : index
    %c0_0 = arith.constant 0 : index
    %c0_1 = arith.constant 0 : index
    %0 = vector.load %arg1[%c0, %c0_0, %c0_1] : memref<1x8x8xf32, #tpu.memory_space<vmem>>, vector<1x8x8xf32>
    %1 = vector.shape_cast %0 : vector<1x8x8xf32> to vector<8x8xf32>
    %c0_2 = arith.constant 0 : index
    %c0_3 = arith.constant 0 : index
    %c0_4 = arith.constant 0 : index
    %2 = vector.load %arg2[%c0_2, %c0_3, %c0_4] : memref<1x1x8xf32, #tpu.memory_space<vmem>>, vector<1x1x8xf32>
    %3 = vector.shape_cast %2 : vector<1x1x8xf32> to vector<1x8xf32>
    %c0_5 = arith.constant 0 : index
    %c0_6 = arith.constant 0 : index
    %c0_7 = arith.constant 0 : index
    %4 = vector.load %arg3[%c0_5, %c0_6, %c0_7] : memref<1x8x1xf32, #tpu.memory_space<vmem>>, vector<1x8x1xf32>
    %5 = vector.shape_cast %4 : vector<1x8x1xf32> to vector<8x1xf32>
    %6 = tpu.iota {dimensions = array<i32: 0>} : vector<8x8xi32>
    %7 = tpu.iota {dimensions = array<i32: 1>} : vector<8x8xi32>
    %c-2_i32 = arith.constant -2 : i32
    %8 = vector.broadcast %c-2_i32 : i32 to vector<8x8xi32>
    %9 = arith.addi %6, %8 : vector<8x8xi32>
    %10 = arith.cmpi eq, %7, %9 : vector<8x8xi32>
    %11 = arith.extui %10 : vector<8x8xi1> to vector<8x8xi32>
    %12 = arith.sitofp %11 : vector<8x8xi32> to vector<8x8xf32>
    %13 = tpu.iota {dimensions = array<i32: 0>} : vector<8x8xi32>
    %14 = tpu.iota {dimensions = array<i32: 1>} : vector<8x8xi32>
    %c-1_i32 = arith.constant -1 : i32
    %15 = vector.broadcast %c-1_i32 : i32 to vector<8x8xi32>
    %16 = arith.addi %13, %15 : vector<8x8xi32>
    %17 = arith.cmpi eq, %14, %16 : vector<8x8xi32>
    %18 = arith.extui %17 : vector<8x8xi1> to vector<8x8xi32>
    %19 = arith.sitofp %18 : vector<8x8xi32> to vector<8x8xf32>
    %20 = tpu.iota {dimensions = array<i32: 0>} : vector<8x8xi32>
    %21 = tpu.iota {dimensions = array<i32: 1>} : vector<8x8xi32>
    %c1_i32 = arith.constant 1 : i32
    %22 = vector.broadcast %c1_i32 : i32 to vector<8x8xi32>
    %23 = arith.addi %20, %22 : vector<8x8xi32>
    %24 = arith.cmpi eq, %21, %23 : vector<8x8xi32>
    %25 = arith.extui %24 : vector<8x8xi1> to vector<8x8xi32>
    %26 = arith.sitofp %25 : vector<8x8xi32> to vector<8x8xf32>
    %27 = tpu.iota {dimensions = array<i32: 0>} : vector<8x8xi32>
    %28 = tpu.iota {dimensions = array<i32: 1>} : vector<8x8xi32>
    %c2_i32 = arith.constant 2 : i32
    %29 = vector.broadcast %c2_i32 : i32 to vector<8x8xi32>
    %30 = arith.addi %27, %29 : vector<8x8xi32>
    %31 = arith.cmpi eq, %28, %30 : vector<8x8xi32>
    %32 = arith.extui %31 : vector<8x8xi1> to vector<8x8xi32>
    %33 = arith.sitofp %32 : vector<8x8xi32> to vector<8x8xf32>
    %c0_8 = arith.constant 0 : index
    %c0_9 = arith.constant 0 : index
    %34 = vector.load %arg4[%c0_8, %c0_9] : memref<24x8xf32, #tpu.memory_space<vmem>>, vector<8x8xf32>
    %cst = arith.constant dense<0.000000e+00> : vector<8x8xf32>
    %35 = tpu.matmul %19, %1, %cst {dimension_numbers = #tpu.dot_dimension_numbers<[1], [0], [0], [1], [0, 0, 1, 1], [], []>} : vector<8x8xf32>, vector<8x8xf32>, vector<8x8xf32> -> vector<8x8xf32>
    %cst_10 = arith.constant dense<0.000000e+00> : vector<8x8xf32>
    %36 = tpu.matmul %35, %34, %cst_10 {dimension_numbers = #tpu.dot_dimension_numbers<[1], [0], [0], [1], [0, 0, 1, 1], [], []>} : vector<8x8xf32>, vector<8x8xf32>, vector<8x8xf32> -> vector<8x8xf32>
    %c8 = arith.constant 8 : index
    %c0_11 = arith.constant 0 : index
    %37 = vector.load %arg4[%c8, %c0_11] : memref<24x8xf32, #tpu.memory_space<vmem>>, vector<8x8xf32>
    %cst_12 = arith.constant dense<0.000000e+00> : vector<8x8xf32>
    %38 = tpu.matmul %1, %37, %cst_12 {dimension_numbers = #tpu.dot_dimension_numbers<[1], [0], [0], [1], [0, 0, 1, 1], [], []>} : vector<8x8xf32>, vector<8x8xf32>, vector<8x8xf32> -> vector<8x8xf32>
    %39 = arith.addf %36, %38 : vector<8x8xf32>
    %c16 = arith.constant 16 : index
    %c0_13 = arith.constant 0 : index
    %40 = vector.load %arg4[%c16, %c0_13] : memref<24x8xf32, #tpu.memory_space<vmem>>, vector<8x8xf32>
    %cst_14 = arith.constant dense<0.000000e+00> : vector<8x8xf32>
    %41 = tpu.matmul %26, %1, %cst_14 {dimension_numbers = #tpu.dot_dimension_numbers<[1], [0], [0], [1], [0, 0, 1, 1], [], []>} : vector<8x8xf32>, vector<8x8xf32>, vector<8x8xf32> -> vector<8x8xf32>
    %cst_15 = arith.constant dense<0.000000e+00> : vector<8x8xf32>
    %42 = tpu.matmul %41, %40, %cst_15 {dimension_numbers = #tpu.dot_dimension_numbers<[1], [0], [0], [1], [0, 0, 1, 1], [], []>} : vector<8x8xf32>, vector<8x8xf32>, vector<8x8xf32> -> vector<8x8xf32>
    %43 = arith.addf %39, %42 : vector<8x8xf32>
    %c0_16 = arith.constant 0 : index
    %c0_17 = arith.constant 0 : index
    %44 = vector.load %arg5[%c0_16, %c0_17] : memref<1x8xf32, #tpu.memory_space<vmem>>, vector<1x8xf32>
    %45 = vector.broadcast %44 : vector<1x8xf32> to vector<8x8xf32>
    %46 = arith.addf %43, %45 : vector<8x8xf32>
    %47 = vector.broadcast %5 : vector<8x1xf32> to vector<8x8xf32>
    %48 = arith.mulf %46, %47 : vector<8x8xf32>
    %cst_18 = arith.constant 0.000000e+00 : f32
    %49 = vector.broadcast %cst_18 : f32 to vector<8x8xf32>
    %50 = arith.cmpf oge, %48, %49 : vector<8x8xf32>
    %cst_19 = arith.constant 0.00999999977 : f32
    %51 = vector.broadcast %cst_19 : f32 to vector<8x8xf32>
    %52 = arith.mulf %51, %48 : vector<8x8xf32>
    %53 = arith.select %50, %48, %52 : vector<8x8xi1>, vector<8x8xf32>
    %c0_20 = arith.constant 0 : index
    %c0_21 = arith.constant 0 : index
    %54 = vector.load %arg8[%c0_20, %c0_21] : memref<24x8xf32, #tpu.memory_space<vmem>>, vector<8x8xf32>
    %cst_22 = arith.constant dense<0.000000e+00> : vector<8x8xf32>
    %55 = tpu.matmul %19, %53, %cst_22 {dimension_numbers = #tpu.dot_dimension_numbers<[1], [0], [0], [1], [0, 0, 1, 1], [], []>} : vector<8x8xf32>, vector<8x8xf32>, vector<8x8xf32> -> vector<8x8xf32>
    %cst_23 = arith.constant dense<0.000000e+00> : vector<8x8xf32>
    %56 = tpu.matmul %55, %54, %cst_23 {dimension_numbers = #tpu.dot_dimension_numbers<[1], [0], [0], [1], [0, 0, 1, 1], [], []>} : vector<8x8xf32>, vector<8x8xf32>, vector<8x8xf32> -> vector<8x8xf32>
    %c8_24 = arith.constant 8 : index
    %c0_25 = arith.constant 0 : index
    %57 = vector.load %arg8[%c8_24, %c0_25] : memref<24x8xf32, #tpu.memory_space<vmem>>, vector<8x8xf32>
    %cst_26 = arith.constant dense<0.000000e+00> : vector<8x8xf32>
    %58 = tpu.matmul %53, %57, %cst_26 {dimension_numbers = #tpu.dot_dimension_numbers<[1], [0], [0], [1], [0, 0, 1, 1], [], []>} : vector<8x8xf32>, vector<8x8xf32>, vector<8x8xf32> -> vector<8x8xf32>
    %59 = arith.addf %56, %58 : vector<8x8xf32>
    %c16_27 = arith.constant 16 : index
    %c0_28 = arith.constant 0 : index
    %60 = vector.load %arg8[%c16_27, %c0_28] : memref<24x8xf32, #tpu.memory_space<vmem>>, vector<8x8xf32>
    %cst_29 = arith.constant dense<0.000000e+00> : vector<8x8xf32>
    %61 = tpu.matmul %26, %53, %cst_29 {dimension_numbers = #tpu.dot_dimension_numbers<[1], [0], [0], [1], [0, 0, 1, 1], [], []>} : vector<8x8xf32>, vector<8x8xf32>, vector<8x8xf32> -> vector<8x8xf32>
    %cst_30 = arith.constant dense<0.000000e+00> : vector<8x8xf32>
    %62 = tpu.matmul %61, %60, %cst_30 {dimension_numbers = #tpu.dot_dimension_numbers<[1], [0], [0], [1], [0, 0, 1, 1], [], []>} : vector<8x8xf32>, vector<8x8xf32>, vector<8x8xf32> -> vector<8x8xf32>
    %63 = arith.addf %59, %62 : vector<8x8xf32>
    %c0_31 = arith.constant 0 : index
    %c0_32 = arith.constant 0 : index
    %64 = vector.load %arg9[%c0_31, %c0_32] : memref<1x8xf32, #tpu.memory_space<vmem>>, vector<1x8xf32>
    %65 = vector.broadcast %64 : vector<1x8xf32> to vector<8x8xf32>
    %66 = arith.addf %63, %65 : vector<8x8xf32>
    %67 = vector.broadcast %5 : vector<8x1xf32> to vector<8x8xf32>
    %68 = arith.mulf %66, %67 : vector<8x8xf32>
    %cst_33 = arith.constant 0.000000e+00 : f32
    %69 = vector.broadcast %cst_33 : f32 to vector<8x8xf32>
    %70 = arith.cmpf oge, %68, %69 : vector<8x8xf32>
    %cst_34 = arith.constant 0.00999999977 : f32
    %71 = vector.broadcast %cst_34 : f32 to vector<8x8xf32>
    %72 = arith.mulf %71, %68 : vector<8x8xf32>
    %73 = arith.select %70, %68, %72 : vector<8x8xi1>, vector<8x8xf32>
    %c0_35 = arith.constant 0 : index
    %c0_36 = arith.constant 0 : index
    %74 = vector.load %arg6[%c0_35, %c0_36] : memref<40x8xf32, #tpu.memory_space<vmem>>, vector<8x8xf32>
    %cst_37 = arith.constant dense<0.000000e+00> : vector<8x8xf32>
    %75 = tpu.matmul %12, %1, %cst_37 {dimension_numbers = #tpu.dot_dimension_numbers<[1], [0], [0], [1], [0, 0, 1, 1], [], []>} : vector<8x8xf32>, vector<8x8xf32>, vector<8x8xf32> -> vector<8x8xf32>
    %cst_38 = arith.constant dense<0.000000e+00> : vector<8x8xf32>
    %76 = tpu.matmul %75, %74, %cst_38 {dimension_numbers = #tpu.dot_dimension_numbers<[1], [0], [0], [1], [0, 0, 1, 1], [], []>} : vector<8x8xf32>, vector<8x8xf32>, vector<8x8xf32> -> vector<8x8xf32>
    %c8_39 = arith.constant 8 : index
    %c0_40 = arith.constant 0 : index
    %77 = vector.load %arg6[%c8_39, %c0_40] : memref<40x8xf32, #tpu.memory_space<vmem>>, vector<8x8xf32>
    %cst_41 = arith.constant dense<0.000000e+00> : vector<8x8xf32>
    %78 = tpu.matmul %19, %1, %cst_41 {dimension_numbers = #tpu.dot_dimension_numbers<[1], [0], [0], [1], [0, 0, 1, 1], [], []>} : vector<8x8xf32>, vector<8x8xf32>, vector<8x8xf32> -> vector<8x8xf32>
    %cst_42 = arith.constant dense<0.000000e+00> : vector<8x8xf32>
    %79 = tpu.matmul %78, %77, %cst_42 {dimension_numbers = #tpu.dot_dimension_numbers<[1], [0], [0], [1], [0, 0, 1, 1], [], []>} : vector<8x8xf32>, vector<8x8xf32>, vector<8x8xf32> -> vector<8x8xf32>
    %80 = arith.addf %76, %79 : vector<8x8xf32>
    %c16_43 = arith.constant 16 : index
    %c0_44 = arith.constant 0 : index
    %81 = vector.load %arg6[%c16_43, %c0_44] : memref<40x8xf32, #tpu.memory_space<vmem>>, vector<8x8xf32>
    %cst_45 = arith.constant dense<0.000000e+00> : vector<8x8xf32>
    %82 = tpu.matmul %1, %81, %cst_45 {dimension_numbers = #tpu.dot_dimension_numbers<[1], [0], [0], [1], [0, 0, 1, 1], [], []>} : vector<8x8xf32>, vector<8x8xf32>, vector<8x8xf32> -> vector<8x8xf32>
    %83 = arith.addf %80, %82 : vector<8x8xf32>
    %c24 = arith.constant 24 : index
    %c0_46 = arith.constant 0 : index
    %84 = vector.load %arg6[%c24, %c0_46] : memref<40x8xf32, #tpu.memory_space<vmem>>, vector<8x8xf32>
    %cst_47 = arith.constant dense<0.000000e+00> : vector<8x8xf32>
    %85 = tpu.matmul %26, %1, %cst_47 {dimension_numbers = #tpu.dot_dimension_numbers<[1], [0], [0], [1], [0, 0, 1, 1], [], []>} : vector<8x8xf32>, vector<8x8xf32>, vector<8x8xf32> -> vector<8x8xf32>
    %cst_48 = arith.constant dense<0.000000e+00> : vector<8x8xf32>
    %86 = tpu.matmul %85, %84, %cst_48 {dimension_numbers = #tpu.dot_dimension_numbers<[1], [0], [0], [1], [0, 0, 1, 1], [], []>} : vector<8x8xf32>, vector<8x8xf32>, vector<8x8xf32> -> vector<8x8xf32>
    %87 = arith.addf %83, %86 : vector<8x8xf32>
    %c32 = arith.constant 32 : index
    %c0_49 = arith.constant 0 : index
    %88 = vector.load %arg6[%c32, %c0_49] : memref<40x8xf32, #tpu.memory_space<vmem>>, vector<8x8xf32>
    %cst_50 = arith.constant dense<0.000000e+00> : vector<8x8xf32>
    %89 = tpu.matmul %33, %1, %cst_50 {dimension_numbers = #tpu.dot_dimension_numbers<[1], [0], [0], [1], [0, 0, 1, 1], [], []>} : vector<8x8xf32>, vector<8x8xf32>, vector<8x8xf32> -> vector<8x8xf32>
    %cst_51 = arith.constant dense<0.000000e+00> : vector<8x8xf32>
    %90 = tpu.matmul %89, %88, %cst_51 {dimension_numbers = #tpu.dot_dimension_numbers<[1], [0], [0], [1], [0, 0, 1, 1], [], []>} : vector<8x8xf32>, vector<8x8xf32>, vector<8x8xf32> -> vector<8x8xf32>
    %91 = arith.addf %87, %90 : vector<8x8xf32>
    %c0_52 = arith.constant 0 : index
    %c0_53 = arith.constant 0 : index
    %92 = vector.load %arg7[%c0_52, %c0_53] : memref<1x8xf32, #tpu.memory_space<vmem>>, vector<1x8xf32>
    %93 = vector.broadcast %92 : vector<1x8xf32> to vector<8x8xf32>
    %94 = arith.addf %91, %93 : vector<8x8xf32>
    %95 = vector.broadcast %5 : vector<8x1xf32> to vector<8x8xf32>
    %96 = arith.mulf %94, %95 : vector<8x8xf32>
    %cst_54 = arith.constant 0.000000e+00 : f32
    %97 = vector.broadcast %cst_54 : f32 to vector<8x8xf32>
    %98 = arith.cmpf oge, %96, %97 : vector<8x8xf32>
    %cst_55 = arith.constant 0.00999999977 : f32
    %99 = vector.broadcast %cst_55 : f32 to vector<8x8xf32>
    %100 = arith.mulf %99, %96 : vector<8x8xf32>
    %101 = arith.select %98, %96, %100 : vector<8x8xi1>, vector<8x8xf32>
    %c0_56 = arith.constant 0 : index
    %c0_57 = arith.constant 0 : index
    %102 = vector.load %arg10[%c0_56, %c0_57] : memref<40x8xf32, #tpu.memory_space<vmem>>, vector<8x8xf32>
    %cst_58 = arith.constant dense<0.000000e+00> : vector<8x8xf32>
    %103 = tpu.matmul %12, %101, %cst_58 {dimension_numbers = #tpu.dot_dimension_numbers<[1], [0], [0], [1], [0, 0, 1, 1], [], []>} : vector<8x8xf32>, vector<8x8xf32>, vector<8x8xf32> -> vector<8x8xf32>
    %cst_59 = arith.constant dense<0.000000e+00> : vector<8x8xf32>
    %104 = tpu.matmul %103, %102, %cst_59 {dimension_numbers = #tpu.dot_dimension_numbers<[1], [0], [0], [1], [0, 0, 1, 1], [], []>} : vector<8x8xf32>, vector<8x8xf32>, vector<8x8xf32> -> vector<8x8xf32>
    %c8_60 = arith.constant 8 : index
    %c0_61 = arith.constant 0 : index
    %105 = vector.load %arg10[%c8_60, %c0_61] : memref<40x8xf32, #tpu.memory_space<vmem>>, vector<8x8xf32>
    %cst_62 = arith.constant dense<0.000000e+00> : vector<8x8xf32>
    %106 = tpu.matmul %19, %101, %cst_62 {dimension_numbers = #tpu.dot_dimension_numbers<[1], [0], [0], [1], [0, 0, 1, 1], [], []>} : vector<8x8xf32>, vector<8x8xf32>, vector<8x8xf32> -> vector<8x8xf32>
    %cst_63 = arith.constant dense<0.000000e+00> : vector<8x8xf32>
    %107 = tpu.matmul %106, %105, %cst_63 {dimension_numbers = #tpu.dot_dimension_numbers<[1], [0], [0], [1], [0, 0, 1, 1], [], []>} : vector<8x8xf32>, vector<8x8xf32>, vector<8x8xf32> -> vector<8x8xf32>
    %108 = arith.addf %104, %107 : vector<8x8xf32>
    %c16_64 = arith.constant 16 : index
    %c0_65 = arith.constant 0 : index
    %109 = vector.load %arg10[%c16_64, %c0_65] : memref<40x8xf32, #tpu.memory_space<vmem>>, vector<8x8xf32>
    %cst_66 = arith.constant dense<0.000000e+00> : vector<8x8xf32>
    %110 = tpu.matmul %101, %109, %cst_66 {dimension_numbers = #tpu.dot_dimension_numbers<[1], [0], [0], [1], [0, 0, 1, 1], [], []>} : vector<8x8xf32>, vector<8x8xf32>, vector<8x8xf32> -> vector<8x8xf32>
    %111 = arith.addf %108, %110 : vector<8x8xf32>
    %c24_67 = arith.constant 24 : index
    %c0_68 = arith.constant 0 : index
    %112 = vector.load %arg10[%c24_67, %c0_68] : memref<40x8xf32, #tpu.memory_space<vmem>>, vector<8x8xf32>
    %cst_69 = arith.constant dense<0.000000e+00> : vector<8x8xf32>
    %113 = tpu.matmul %26, %101, %cst_69 {dimension_numbers = #tpu.dot_dimension_numbers<[1], [0], [0], [1], [0, 0, 1, 1], [], []>} : vector<8x8xf32>, vector<8x8xf32>, vector<8x8xf32> -> vector<8x8xf32>
    %cst_70 = arith.constant dense<0.000000e+00> : vector<8x8xf32>
    %114 = tpu.matmul %113, %112, %cst_70 {dimension_numbers = #tpu.dot_dimension_numbers<[1], [0], [0], [1], [0, 0, 1, 1], [], []>} : vector<8x8xf32>, vector<8x8xf32>, vector<8x8xf32> -> vector<8x8xf32>
    %115 = arith.addf %111, %114 : vector<8x8xf32>
    %c32_71 = arith.constant 32 : index
    %c0_72 = arith.constant 0 : index
    %116 = vector.load %arg10[%c32_71, %c0_72] : memref<40x8xf32, #tpu.memory_space<vmem>>, vector<8x8xf32>
    %cst_73 = arith.constant dense<0.000000e+00> : vector<8x8xf32>
    %117 = tpu.matmul %33, %101, %cst_73 {dimension_numbers = #tpu.dot_dimension_numbers<[1], [0], [0], [1], [0, 0, 1, 1], [], []>} : vector<8x8xf32>, vector<8x8xf32>, vector<8x8xf32> -> vector<8x8xf32>
    %cst_74 = arith.constant dense<0.000000e+00> : vector<8x8xf32>
    %118 = tpu.matmul %117, %116, %cst_74 {dimension_numbers = #tpu.dot_dimension_numbers<[1], [0], [0], [1], [0, 0, 1, 1], [], []>} : vector<8x8xf32>, vector<8x8xf32>, vector<8x8xf32> -> vector<8x8xf32>
    %119 = arith.addf %115, %118 : vector<8x8xf32>
    %c0_75 = arith.constant 0 : index
    %c0_76 = arith.constant 0 : index
    %120 = vector.load %arg11[%c0_75, %c0_76] : memref<1x8xf32, #tpu.memory_space<vmem>>, vector<1x8xf32>
    %121 = vector.broadcast %120 : vector<1x8xf32> to vector<8x8xf32>
    %122 = arith.addf %119, %121 : vector<8x8xf32>
    %123 = vector.broadcast %5 : vector<8x1xf32> to vector<8x8xf32>
    %124 = arith.mulf %122, %123 : vector<8x8xf32>
    %cst_77 = arith.constant 0.000000e+00 : f32
    %125 = vector.broadcast %cst_77 : f32 to vector<8x8xf32>
    %126 = arith.cmpf oge, %124, %125 : vector<8x8xf32>
    %cst_78 = arith.constant 0.00999999977 : f32
    %127 = vector.broadcast %cst_78 : f32 to vector<8x8xf32>
    %128 = arith.mulf %127, %124 : vector<8x8xf32>
    %129 = arith.select %126, %124, %128 : vector<8x8xi1>, vector<8x8xf32>
    %130 = tpu.concatenate %1, %73, %129 in 1 : vector<8x8xf32>, vector<8x8xf32>, vector<8x8xf32> -> vector<8x24xf32>
    %c0_79 = arith.constant 0 : index
    %c0_80 = arith.constant 0 : index
    %131 = vector.load %arg12[%c0_79, %c0_80] : memref<24x16xf32, #tpu.memory_space<vmem>>, vector<24x16xf32>
    %cst_81 = arith.constant dense<0.000000e+00> : vector<8x16xf32>
    %132 = tpu.matmul %130, %131, %cst_81 {dimension_numbers = #tpu.dot_dimension_numbers<[1], [0], [0], [1], [0, 0, 1, 1], [], []>} : vector<8x24xf32>, vector<24x16xf32>, vector<8x16xf32> -> vector<8x16xf32>
    %c0_82 = arith.constant 0 : index
    %c0_83 = arith.constant 0 : index
    %133 = vector.load %arg13[%c0_82, %c0_83] : memref<1x16xf32, #tpu.memory_space<vmem>>, vector<1x16xf32>
    %134 = vector.broadcast %133 : vector<1x16xf32> to vector<8x16xf32>
    %135 = arith.addf %132, %134 : vector<8x16xf32>
    %136 = vector.broadcast %5 : vector<8x1xf32> to vector<8x16xf32>
    %137 = arith.mulf %135, %136 : vector<8x16xf32>
    %cst_84 = arith.constant 0.000000e+00 : f32
    %138 = vector.broadcast %cst_84 : f32 to vector<8x16xf32>
    %139 = arith.maximumf %137, %138 : vector<8x16xf32>
    %c0_85 = arith.constant 0 : index
    %c0_86 = arith.constant 0 : index
    %140 = vector.load %arg14[%c0_85, %c0_86] : memref<1x16xf32, #tpu.memory_space<vmem>>, vector<1x16xf32>
    %c0_87 = arith.constant 0 : index
    %c0_88 = arith.constant 0 : index
    %141 = vector.load %arg15[%c0_87, %c0_88] : memref<1x16xf32, #tpu.memory_space<vmem>>, vector<1x16xf32>
    %cst_89 = arith.constant dense<0.000000e+00> : vector<8xf32>
    %142 = vector.multi_reduction <add>, %139, %cst_89 [1] : vector<8x16xf32> to vector<8xf32>
    %143 = vector.shape_cast %142 : vector<8xf32> to vector<8x1xf32>
    %cst_90 = arith.constant 1.600000e+01 : f32
    %144 = vector.broadcast %cst_90 : f32 to vector<8x1xf32>
    %145 = arith.divf %143, %144 : vector<8x1xf32>
    %146 = vector.broadcast %145 : vector<8x1xf32> to vector<8x16xf32>
    %147 = arith.subf %139, %146 : vector<8x16xf32>
    %148 = vector.broadcast %145 : vector<8x1xf32> to vector<8x16xf32>
    %149 = arith.subf %139, %148 : vector<8x16xf32>
    %150 = arith.mulf %147, %149 : vector<8x16xf32>
    %cst_91 = arith.constant dense<0.000000e+00> : vector<8xf32>
    %151 = vector.multi_reduction <add>, %150, %cst_91 [1] : vector<8x16xf32> to vector<8xf32>
    %152 = vector.shape_cast %151 : vector<8xf32> to vector<8x1xf32>
    %cst_92 = arith.constant 1.600000e+01 : f32
    %153 = vector.broadcast %cst_92 : f32 to vector<8x1xf32>
    %154 = arith.divf %152, %153 : vector<8x1xf32>
    %155 = vector.broadcast %145 : vector<8x1xf32> to vector<8x16xf32>
    %156 = arith.subf %139, %155 : vector<8x16xf32>
    %cst_93 = arith.constant 9.99999974E-6 : f32
    %157 = vector.broadcast %cst_93 : f32 to vector<8x1xf32>
    %158 = arith.addf %154, %157 : vector<8x1xf32>
    %159 = math.rsqrt %158 : vector<8x1xf32>
    %160 = vector.broadcast %159 : vector<8x1xf32> to vector<8x16xf32>
    %161 = arith.mulf %156, %160 : vector<8x16xf32>
    %162 = vector.broadcast %140 : vector<1x16xf32> to vector<8x16xf32>
    %163 = arith.mulf %161, %162 : vector<8x16xf32>
    %164 = vector.broadcast %141 : vector<1x16xf32> to vector<8x16xf32>
    %165 = arith.addf %163, %164 : vector<8x16xf32>
    %c0_94 = arith.constant 0 : index
    %c0_95 = arith.constant 0 : index
    %166 = vector.load %arg16[%c0_94, %c0_95] : memref<16x16xf32, #tpu.memory_space<vmem>>, vector<16x16xf32>
    %cst_96 = arith.constant dense<0.000000e+00> : vector<8x16xf32>
    %167 = tpu.matmul %165, %166, %cst_96 {dimension_numbers = #tpu.dot_dimension_numbers<[1], [0], [0], [1], [0, 0, 1, 1], [], []>} : vector<8x16xf32>, vector<16x16xf32>, vector<8x16xf32> -> vector<8x16xf32>
    %c0_97 = arith.constant 0 : index
    %c0_98 = arith.constant 0 : index
    %168 = vector.load %arg17[%c0_97, %c0_98] : memref<1x16xf32, #tpu.memory_space<vmem>>, vector<1x16xf32>
    %169 = vector.broadcast %168 : vector<1x16xf32> to vector<8x16xf32>
    %170 = arith.addf %167, %169 : vector<8x16xf32>
    %cst_99 = arith.constant 0.000000e+00 : f32
    %171 = vector.broadcast %cst_99 : f32 to vector<8x16xf32>
    %172 = arith.cmpf oge, %170, %171 : vector<8x16xf32>
    %cst_100 = arith.constant 0.00999999977 : f32
    %173 = vector.broadcast %cst_100 : f32 to vector<8x16xf32>
    %174 = arith.mulf %173, %170 : vector<8x16xf32>
    %175 = arith.select %172, %170, %174 : vector<8x16xi1>, vector<8x16xf32>
    %cst_101 = arith.constant 0.000000e+00 : f32
    %176 = vector.broadcast %cst_101 : f32 to vector<1x8xf32>
    %177 = arith.cmpf oeq, %3, %176 : vector<1x8xf32>
    %178 = vector.extract_strided_slice %175 {offsets = [0, 0], sizes = [8, 8], strides = [1, 1]} : vector<8x16xf32> to vector<8x8xf32>
    %cst_102 = arith.constant 0.000000e+00 : f32
    %179 = vector.broadcast %cst_102 : f32 to vector<1x8xf32>
    %cst_103 = arith.constant -1.000000e+20 : f32
    %180 = vector.broadcast %cst_103 : f32 to vector<1x8xf32>
    %181 = arith.select %177, %180, %179 : vector<1x8xi1>, vector<1x8xf32>
    %cst_104 = arith.constant dense<0xFF800000> : vector<1xf32>
    %182 = vector.multi_reduction <maximumf>, %181, %cst_104 [1] : vector<1x8xf32> to vector<1xf32>
    %183 = vector.shape_cast %182 : vector<1xf32> to vector<1x1xf32>
    %184 = vector.broadcast %183 : vector<1x1xf32> to vector<1x8xf32>
    %185 = arith.subf %181, %184 : vector<1x8xf32>
    %186 = math.exp %185 : vector<1x8xf32>
    %cst_105 = arith.constant dense<0.000000e+00> : vector<1xf32>
    %187 = vector.multi_reduction <add>, %186, %cst_105 [1] : vector<1x8xf32> to vector<1xf32>
    %188 = vector.shape_cast %187 : vector<1xf32> to vector<1x1xf32>
    %189 = vector.broadcast %188 : vector<1x1xf32> to vector<1x8xf32>
    %190 = arith.divf %186, %189 : vector<1x8xf32>
    %191 = arith.mulf %190, %3 : vector<1x8xf32>
    %cst_106 = arith.constant dense<0.000000e+00> : vector<1x8xf32>
    %192 = tpu.matmul %191, %178, %cst_106 {dimension_numbers = #tpu.dot_dimension_numbers<[1], [0], [0], [1], [0, 0, 1, 1], [], []>} : vector<1x8xf32>, vector<8x8xf32>, vector<1x8xf32> -> vector<1x8xf32>
    %193 = math.tanh %192 : vector<1x8xf32>
    %cst_107 = arith.constant dense<0.000000e+00> : vector<1x8xf32>
    %194 = tpu.matmul %193, %178, %cst_107 {dimension_numbers = #tpu.dot_dimension_numbers<[1], [1], [0], [0], [0, 0, 1, 0], [], []>} : vector<1x8xf32>, vector<8x8xf32>, vector<1x8xf32> -> vector<1x8xf32>
    %195 = arith.addf %179, %194 : vector<1x8xf32>
    %cst_108 = arith.constant -1.000000e+20 : f32
    %196 = vector.broadcast %cst_108 : f32 to vector<1x8xf32>
    %197 = arith.select %177, %196, %195 : vector<1x8xi1>, vector<1x8xf32>
    %cst_109 = arith.constant dense<0xFF800000> : vector<1xf32>
    %198 = vector.multi_reduction <maximumf>, %197, %cst_109 [1] : vector<1x8xf32> to vector<1xf32>
    %199 = vector.shape_cast %198 : vector<1xf32> to vector<1x1xf32>
    %200 = vector.broadcast %199 : vector<1x1xf32> to vector<1x8xf32>
    %201 = arith.subf %197, %200 : vector<1x8xf32>
    %202 = math.exp %201 : vector<1x8xf32>
    %cst_110 = arith.constant dense<0.000000e+00> : vector<1xf32>
    %203 = vector.multi_reduction <add>, %202, %cst_110 [1] : vector<1x8xf32> to vector<1xf32>
    %204 = vector.shape_cast %203 : vector<1xf32> to vector<1x1xf32>
    %205 = vector.broadcast %204 : vector<1x1xf32> to vector<1x8xf32>
    %206 = arith.divf %202, %205 : vector<1x8xf32>
    %207 = arith.mulf %206, %3 : vector<1x8xf32>
    %cst_111 = arith.constant dense<0.000000e+00> : vector<1x8xf32>
    %208 = tpu.matmul %207, %178, %cst_111 {dimension_numbers = #tpu.dot_dimension_numbers<[1], [0], [0], [1], [0, 0, 1, 1], [], []>} : vector<1x8xf32>, vector<8x8xf32>, vector<1x8xf32> -> vector<1x8xf32>
    %209 = math.tanh %208 : vector<1x8xf32>
    %cst_112 = arith.constant dense<0.000000e+00> : vector<1x8xf32>
    %210 = tpu.matmul %209, %178, %cst_112 {dimension_numbers = #tpu.dot_dimension_numbers<[1], [1], [0], [0], [0, 0, 1, 0], [], []>} : vector<1x8xf32>, vector<8x8xf32>, vector<1x8xf32> -> vector<1x8xf32>
    %211 = arith.addf %195, %210 : vector<1x8xf32>
    %cst_113 = arith.constant -1.000000e+20 : f32
    %212 = vector.broadcast %cst_113 : f32 to vector<1x8xf32>
    %213 = arith.select %177, %212, %211 : vector<1x8xi1>, vector<1x8xf32>
    %cst_114 = arith.constant dense<0xFF800000> : vector<1xf32>
    %214 = vector.multi_reduction <maximumf>, %213, %cst_114 [1] : vector<1x8xf32> to vector<1xf32>
    %215 = vector.shape_cast %214 : vector<1xf32> to vector<1x1xf32>
    %216 = vector.broadcast %215 : vector<1x1xf32> to vector<1x8xf32>
    %217 = arith.subf %213, %216 : vector<1x8xf32>
    %218 = math.exp %217 : vector<1x8xf32>
    %cst_115 = arith.constant dense<0.000000e+00> : vector<1xf32>
    %219 = vector.multi_reduction <add>, %218, %cst_115 [1] : vector<1x8xf32> to vector<1xf32>
    %220 = vector.shape_cast %219 : vector<1xf32> to vector<1x1xf32>
    %221 = vector.broadcast %220 : vector<1x1xf32> to vector<1x8xf32>
    %222 = arith.divf %218, %221 : vector<1x8xf32>
    %223 = arith.mulf %222, %3 : vector<1x8xf32>
    %cst_116 = arith.constant dense<0.000000e+00> : vector<1x8xf32>
    %224 = tpu.matmul %223, %178, %cst_116 {dimension_numbers = #tpu.dot_dimension_numbers<[1], [0], [0], [1], [0, 0, 1, 1], [], []>} : vector<1x8xf32>, vector<8x8xf32>, vector<1x8xf32> -> vector<1x8xf32>
    %225 = math.tanh %224 : vector<1x8xf32>
    %226 = vector.extract_strided_slice %175 {offsets = [0, 8], sizes = [8, 8], strides = [1, 1]} : vector<8x16xf32> to vector<8x8xf32>
    %cst_117 = arith.constant 0.000000e+00 : f32
    %227 = vector.broadcast %cst_117 : f32 to vector<1x8xf32>
    %cst_118 = arith.constant -1.000000e+20 : f32
    %228 = vector.broadcast %cst_118 : f32 to vector<1x8xf32>
    %229 = arith.select %177, %228, %227 : vector<1x8xi1>, vector<1x8xf32>
    %cst_119 = arith.constant dense<0xFF800000> : vector<1xf32>
    %230 = vector.multi_reduction <maximumf>, %229, %cst_119 [1] : vector<1x8xf32> to vector<1xf32>
    %231 = vector.shape_cast %230 : vector<1xf32> to vector<1x1xf32>
    %232 = vector.broadcast %231 : vector<1x1xf32> to vector<1x8xf32>
    %233 = arith.subf %229, %232 : vector<1x8xf32>
    %234 = math.exp %233 : vector<1x8xf32>
    %cst_120 = arith.constant dense<0.000000e+00> : vector<1xf32>
    %235 = vector.multi_reduction <add>, %234, %cst_120 [1] : vector<1x8xf32> to vector<1xf32>
    %236 = vector.shape_cast %235 : vector<1xf32> to vector<1x1xf32>
    %237 = vector.broadcast %236 : vector<1x1xf32> to vector<1x8xf32>
    %238 = arith.divf %234, %237 : vector<1x8xf32>
    %239 = arith.mulf %238, %3 : vector<1x8xf32>
    %cst_121 = arith.constant dense<0.000000e+00> : vector<1x8xf32>
    %240 = tpu.matmul %239, %226, %cst_121 {dimension_numbers = #tpu.dot_dimension_numbers<[1], [0], [0], [1], [0, 0, 1, 1], [], []>} : vector<1x8xf32>, vector<8x8xf32>, vector<1x8xf32> -> vector<1x8xf32>
    %241 = math.tanh %240 : vector<1x8xf32>
    %cst_122 = arith.constant dense<0.000000e+00> : vector<1x8xf32>
    %242 = tpu.matmul %241, %226, %cst_122 {dimension_numbers = #tpu.dot_dimension_numbers<[1], [1], [0], [0], [0, 0, 1, 0], [], []>} : vector<1x8xf32>, vector<8x8xf32>, vector<1x8xf32> -> vector<1x8xf32>
    %243 = arith.addf %227, %242 : vector<1x8xf32>
    %cst_123 = arith.constant -1.000000e+20 : f32
    %244 = vector.broadcast %cst_123 : f32 to vector<1x8xf32>
    %245 = arith.select %177, %244, %243 : vector<1x8xi1>, vector<1x8xf32>
    %cst_124 = arith.constant dense<0xFF800000> : vector<1xf32>
    %246 = vector.multi_reduction <maximumf>, %245, %cst_124 [1] : vector<1x8xf32> to vector<1xf32>
    %247 = vector.shape_cast %246 : vector<1xf32> to vector<1x1xf32>
    %248 = vector.broadcast %247 : vector<1x1xf32> to vector<1x8xf32>
    %249 = arith.subf %245, %248 : vector<1x8xf32>
    %250 = math.exp %249 : vector<1x8xf32>
    %cst_125 = arith.constant dense<0.000000e+00> : vector<1xf32>
    %251 = vector.multi_reduction <add>, %250, %cst_125 [1] : vector<1x8xf32> to vector<1xf32>
    %252 = vector.shape_cast %251 : vector<1xf32> to vector<1x1xf32>
    %253 = vector.broadcast %252 : vector<1x1xf32> to vector<1x8xf32>
    %254 = arith.divf %250, %253 : vector<1x8xf32>
    %255 = arith.mulf %254, %3 : vector<1x8xf32>
    %cst_126 = arith.constant dense<0.000000e+00> : vector<1x8xf32>
    %256 = tpu.matmul %255, %226, %cst_126 {dimension_numbers = #tpu.dot_dimension_numbers<[1], [0], [0], [1], [0, 0, 1, 1], [], []>} : vector<1x8xf32>, vector<8x8xf32>, vector<1x8xf32> -> vector<1x8xf32>
    %257 = math.tanh %256 : vector<1x8xf32>
    %cst_127 = arith.constant dense<0.000000e+00> : vector<1x8xf32>
    %258 = tpu.matmul %257, %226, %cst_127 {dimension_numbers = #tpu.dot_dimension_numbers<[1], [1], [0], [0], [0, 0, 1, 0], [], []>} : vector<1x8xf32>, vector<8x8xf32>, vector<1x8xf32> -> vector<1x8xf32>
    %259 = arith.addf %243, %258 : vector<1x8xf32>
    %cst_128 = arith.constant -1.000000e+20 : f32
    %260 = vector.broadcast %cst_128 : f32 to vector<1x8xf32>
    %261 = arith.select %177, %260, %259 : vector<1x8xi1>, vector<1x8xf32>
    %cst_129 = arith.constant dense<0xFF800000> : vector<1xf32>
    %262 = vector.multi_reduction <maximumf>, %261, %cst_129 [1] : vector<1x8xf32> to vector<1xf32>
    %263 = vector.shape_cast %262 : vector<1xf32> to vector<1x1xf32>
    %264 = vector.broadcast %263 : vector<1x1xf32> to vector<1x8xf32>
    %265 = arith.subf %261, %264 : vector<1x8xf32>
    %266 = math.exp %265 : vector<1x8xf32>
    %cst_130 = arith.constant dense<0.000000e+00> : vector<1xf32>
    %267 = vector.multi_reduction <add>, %266, %cst_130 [1] : vector<1x8xf32> to vector<1xf32>
    %268 = vector.shape_cast %267 : vector<1xf32> to vector<1x1xf32>
    %269 = vector.broadcast %268 : vector<1x1xf32> to vector<1x8xf32>
    %270 = arith.divf %266, %269 : vector<1x8xf32>
    %271 = arith.mulf %270, %3 : vector<1x8xf32>
    %cst_131 = arith.constant dense<0.000000e+00> : vector<1x8xf32>
    %272 = tpu.matmul %271, %226, %cst_131 {dimension_numbers = #tpu.dot_dimension_numbers<[1], [0], [0], [1], [0, 0, 1, 1], [], []>} : vector<1x8xf32>, vector<8x8xf32>, vector<1x8xf32> -> vector<1x8xf32>
    %273 = math.tanh %272 : vector<1x8xf32>
    %274 = tpu.concatenate %225, %273 in 1 : vector<1x8xf32>, vector<1x8xf32> -> vector<1x16xf32>
    %c0_132 = arith.constant 0 : index
    %c0_133 = arith.constant 0 : index
    %275 = vector.load %arg18[%c0_132, %c0_133] : memref<1x16xf32, #tpu.memory_space<vmem>>, vector<1x16xf32>
    %c0_134 = arith.constant 0 : index
    %c0_135 = arith.constant 0 : index
    %276 = vector.load %arg19[%c0_134, %c0_135] : memref<1x16xf32, #tpu.memory_space<vmem>>, vector<1x16xf32>
    %cst_136 = arith.constant dense<0.000000e+00> : vector<1xf32>
    %277 = vector.multi_reduction <add>, %274, %cst_136 [1] : vector<1x16xf32> to vector<1xf32>
    %278 = vector.shape_cast %277 : vector<1xf32> to vector<1x1xf32>
    %cst_137 = arith.constant 1.600000e+01 : f32
    %279 = vector.broadcast %cst_137 : f32 to vector<1x1xf32>
    %280 = arith.divf %278, %279 : vector<1x1xf32>
    %281 = vector.broadcast %280 : vector<1x1xf32> to vector<1x16xf32>
    %282 = arith.subf %274, %281 : vector<1x16xf32>
    %283 = vector.broadcast %280 : vector<1x1xf32> to vector<1x16xf32>
    %284 = arith.subf %274, %283 : vector<1x16xf32>
    %285 = arith.mulf %282, %284 : vector<1x16xf32>
    %cst_138 = arith.constant dense<0.000000e+00> : vector<1xf32>
    %286 = vector.multi_reduction <add>, %285, %cst_138 [1] : vector<1x16xf32> to vector<1xf32>
    %287 = vector.shape_cast %286 : vector<1xf32> to vector<1x1xf32>
    %cst_139 = arith.constant 1.600000e+01 : f32
    %288 = vector.broadcast %cst_139 : f32 to vector<1x1xf32>
    %289 = arith.divf %287, %288 : vector<1x1xf32>
    %290 = vector.broadcast %280 : vector<1x1xf32> to vector<1x16xf32>
    %291 = arith.subf %274, %290 : vector<1x16xf32>
    %cst_140 = arith.constant 9.99999974E-6 : f32
    %292 = vector.broadcast %cst_140 : f32 to vector<1x1xf32>
    %293 = arith.addf %289, %292 : vector<1x1xf32>
    %294 = math.rsqrt %293 : vector<1x1xf32>
    %295 = vector.broadcast %294 : vector<1x1xf32> to vector<1x16xf32>
    %296 = arith.mulf %291, %295 : vector<1x16xf32>
    %297 = arith.mulf %296, %275 : vector<1x16xf32>
    %298 = arith.addf %297, %276 : vector<1x16xf32>
    %c0_141 = arith.constant 0 : index
    %c0_142 = arith.constant 0 : index
    %299 = vector.load %arg20[%c0_141, %c0_142] : memref<16x16xf32, #tpu.memory_space<vmem>>, vector<16x16xf32>
    %cst_143 = arith.constant dense<0.000000e+00> : vector<1x16xf32>
    %300 = tpu.matmul %298, %299, %cst_143 {dimension_numbers = #tpu.dot_dimension_numbers<[1], [0], [0], [1], [0, 0, 1, 1], [], []>} : vector<1x16xf32>, vector<16x16xf32>, vector<1x16xf32> -> vector<1x16xf32>
    %c0_144 = arith.constant 0 : index
    %c0_145 = arith.constant 0 : index
    %301 = vector.load %arg21[%c0_144, %c0_145] : memref<1x16xf32, #tpu.memory_space<vmem>>, vector<1x16xf32>
    %302 = arith.addf %300, %301 : vector<1x16xf32>
    %c0_146 = arith.constant 0 : index
    %c0_147 = arith.constant 0 : index
    %303 = vector.load %arg22[%c0_146, %c0_147] : memref<1x16xf32, #tpu.memory_space<vmem>>, vector<1x16xf32>
    %c0_148 = arith.constant 0 : index
    %c0_149 = arith.constant 0 : index
    %304 = vector.load %arg23[%c0_148, %c0_149] : memref<1x16xf32, #tpu.memory_space<vmem>>, vector<1x16xf32>
    %cst_150 = arith.constant dense<0.000000e+00> : vector<1xf32>
    %305 = vector.multi_reduction <add>, %302, %cst_150 [1] : vector<1x16xf32> to vector<1xf32>
    %306 = vector.shape_cast %305 : vector<1xf32> to vector<1x1xf32>
    %cst_151 = arith.constant 1.600000e+01 : f32
    %307 = vector.broadcast %cst_151 : f32 to vector<1x1xf32>
    %308 = arith.divf %306, %307 : vector<1x1xf32>
    %309 = vector.broadcast %308 : vector<1x1xf32> to vector<1x16xf32>
    %310 = arith.subf %302, %309 : vector<1x16xf32>
    %311 = vector.broadcast %308 : vector<1x1xf32> to vector<1x16xf32>
    %312 = arith.subf %302, %311 : vector<1x16xf32>
    %313 = arith.mulf %310, %312 : vector<1x16xf32>
    %cst_152 = arith.constant dense<0.000000e+00> : vector<1xf32>
    %314 = vector.multi_reduction <add>, %313, %cst_152 [1] : vector<1x16xf32> to vector<1xf32>
    %315 = vector.shape_cast %314 : vector<1xf32> to vector<1x1xf32>
    %cst_153 = arith.constant 1.600000e+01 : f32
    %316 = vector.broadcast %cst_153 : f32 to vector<1x1xf32>
    %317 = arith.divf %315, %316 : vector<1x1xf32>
    %318 = vector.broadcast %308 : vector<1x1xf32> to vector<1x16xf32>
    %319 = arith.subf %302, %318 : vector<1x16xf32>
    %cst_154 = arith.constant 9.99999974E-6 : f32
    %320 = vector.broadcast %cst_154 : f32 to vector<1x1xf32>
    %321 = arith.addf %317, %320 : vector<1x1xf32>
    %322 = math.rsqrt %321 : vector<1x1xf32>
    %323 = vector.broadcast %322 : vector<1x1xf32> to vector<1x16xf32>
    %324 = arith.mulf %319, %323 : vector<1x16xf32>
    %325 = arith.mulf %324, %303 : vector<1x16xf32>
    %326 = arith.addf %325, %304 : vector<1x16xf32>
    %c0_155 = arith.constant 0 : index
    %c0_156 = arith.constant 0 : index
    %327 = vector.load %arg24[%c0_155, %c0_156] : memref<16x3xf32, #tpu.memory_space<vmem>>, vector<16x3xf32>
    %cst_157 = arith.constant dense<0.000000e+00> : vector<1x3xf32>
    %328 = tpu.matmul %326, %327, %cst_157 {dimension_numbers = #tpu.dot_dimension_numbers<[1], [0], [0], [1], [0, 0, 1, 1], [], []>} : vector<1x16xf32>, vector<16x3xf32>, vector<1x3xf32> -> vector<1x3xf32>
    %c0_158 = arith.constant 0 : index
    %c0_159 = arith.constant 0 : index
    %329 = vector.load %arg25[%c0_158, %c0_159] : memref<1x3xf32, #tpu.memory_space<vmem>>, vector<1x3xf32>
    %330 = arith.addf %328, %329 : vector<1x3xf32>
    %cst_160 = arith.constant dense<0xFF800000> : vector<1xf32>
    %331 = vector.multi_reduction <maximumf>, %330, %cst_160 [1] : vector<1x3xf32> to vector<1xf32>
    %332 = vector.shape_cast %331 : vector<1xf32> to vector<1x1xf32>
    %333 = vector.broadcast %332 : vector<1x1xf32> to vector<1x3xf32>
    %334 = arith.subf %330, %333 : vector<1x3xf32>
    %335 = math.exp %334 : vector<1x3xf32>
    %cst_161 = arith.constant dense<0.000000e+00> : vector<1xf32>
    %336 = vector.multi_reduction <add>, %335, %cst_161 [1] : vector<1x3xf32> to vector<1xf32>
    %337 = vector.shape_cast %336 : vector<1xf32> to vector<1x1xf32>
    %338 = vector.broadcast %337 : vector<1x1xf32> to vector<1x3xf32>
    %339 = arith.divf %335, %338 : vector<1x3xf32>
    %c0_162 = arith.constant 0 : index
    %c0_163 = arith.constant 0 : index
    %c0_164 = arith.constant 0 : index
    %340 = vector.load %arg26[%c0_162, %c0_163, %c0_164] : memref<1x1x3xf32, #tpu.memory_space<vmem>>, vector<1x1x3xf32>
    %341 = vector.shape_cast %340 : vector<1x1x3xf32> to vector<1x3xf32>
    %342 = vector.shape_cast %339 : vector<1x3xf32> to vector<1x1x3xf32>
    tpu.vector_store %arg26[%c0_162, %c0_163, %c0_164], %342 {strides = array<i32>} : memref<1x1x3xf32, #tpu.memory_space<vmem>>, vector<1x1x3xf32>,
    return
  }
  func.func @transform_0(%arg0: i32) -> (i32, i32, i32) {
    %c0_i32 = arith.constant 0 : i32
    %c0_i32_0 = arith.constant 0 : i32
    %c0_i32_1 = arith.constant 0 : i32
    return %arg0, %c0_i32, %c0_i32_0 : i32, i32, i32
  }
  func.func @transform_1(%arg0: i32) -> (i32, i32, i32) {
    %c0_i32 = arith.constant 0 : i32
    %c0_i32_0 = arith.constant 0 : i32
    %c0_i32_1 = arith.constant 0 : i32
    return %arg0, %c0_i32, %c0_i32_0 : i32, i32, i32
  }
  func.func @transform_2(%arg0: i32) -> (i32, i32, i32) {
    %c0_i32 = arith.constant 0 : i32
    %c0_i32_0 = arith.constant 0 : i32
    %c0_i32_1 = arith.constant 0 : i32
    return %arg0, %c0_i32, %c0_i32_0 : i32, i32, i32
  }
  func.func @transform_3(%arg0: i32) -> (i32, i32) {
    %c0_i32 = arith.constant 0 : i32
    %c0_i32_0 = arith.constant 0 : i32
    %c0_i32_1 = arith.constant 0 : i32
    return %c0_i32, %c0_i32_0 : i32, i32
  }
  func.func @transform_4(%arg0: i32) -> (i32, i32) {
    %c0_i32 = arith.constant 0 : i32
    %c0_i32_0 = arith.constant 0 : i32
    %c0_i32_1 = arith.constant 0 : i32
    return %c0_i32, %c0_i32_0 : i32, i32
  }
  func.func @transform_5(%arg0: i32) -> (i32, i32) {
    %c0_i32 = arith.constant 0 : i32
    %c0_i32_0 = arith.constant 0 : i32
    %c0_i32_1 = arith.constant 0 : i32
    return %c0_i32, %c0_i32_0 : i32, i32
  }
  func.func @transform_6(%arg0: i32) -> (i32, i32) {
    %c0_i32 = arith.constant 0 : i32
    %c0_i32_0 = arith.constant 0 : i32
    %c0_i32_1 = arith.constant 0 : i32
    return %c0_i32, %c0_i32_0 : i32, i32
  }
  func.func @transform_7(%arg0: i32) -> (i32, i32) {
    %c0_i32 = arith.constant 0 : i32
    %c0_i32_0 = arith.constant 0 : i32
    %c0_i32_1 = arith.constant 0 : i32
    return %c0_i32, %c0_i32_0 : i32, i32
  }
  func.func @transform_8(%arg0: i32) -> (i32, i32) {
    %c0_i32 = arith.constant 0 : i32
    %c0_i32_0 = arith.constant 0 : i32
    %c0_i32_1 = arith.constant 0 : i32
    return %c0_i32, %c0_i32_0 : i32, i32
  }
  func.func @transform_9(%arg0: i32) -> (i32, i32) {
    %c0_i32 = arith.constant 0 : i32
    %c0_i32_0 = arith.constant 0 : i32
    %c0_i32_1 = arith.constant 0 : i32
    return %c0_i32, %c0_i32_0 : i32, i32
  }
  func.func @transform_10(%arg0: i32) -> (i32, i32) {
    %c0_i32 = arith.constant 0 : i32
    %c0_i32_0 = arith.constant 0 : i32
    %c0_i32_1 = arith.constant 0 : i32
    return %c0_i32, %c0_i32_0 : i32, i32
  }
  func.func @transform_11(%arg0: i32) -> (i32, i32) {
    %c0_i32 = arith.constant 0 : i32
    %c0_i32_0 = arith.constant 0 : i32
    %c0_i32_1 = arith.constant 0 : i32
    return %c0_i32, %c0_i32_0 : i32, i32
  }
  func.func @transform_12(%arg0: i32) -> (i32, i32) {
    %c0_i32 = arith.constant 0 : i32
    %c0_i32_0 = arith.constant 0 : i32
    %c0_i32_1 = arith.constant 0 : i32
    return %c0_i32, %c0_i32_0 : i32, i32
  }
  func.func @transform_13(%arg0: i32) -> (i32, i32) {
    %c0_i32 = arith.constant 0 : i32
    %c0_i32_0 = arith.constant 0 : i32
    %c0_i32_1 = arith.constant 0 : i32
    return %c0_i32, %c0_i32_0 : i32, i32
  }
  func.func @transform_14(%arg0: i32) -> (i32, i32) {
    %c0_i32 = arith.constant 0 : i32
    %c0_i32_0 = arith.constant 0 : i32
    %c0_i32_1 = arith.constant 0 : i32
    return %c0_i32, %c0_i32_0 : i32, i32
  }
  func.func @transform_15(%arg0: i32) -> (i32, i32) {
    %c0_i32 = arith.constant 0 : i32
    %c0_i32_0 = arith.constant 0 : i32
    %c0_i32_1 = arith.constant 0 : i32
    return %c0_i32, %c0_i32_0 : i32, i32
  }
  func.func @transform_16(%arg0: i32) -> (i32, i32) {
    %c0_i32 = arith.constant 0 : i32
    %c0_i32_0 = arith.constant 0 : i32
    %c0_i32_1 = arith.constant 0 : i32
    return %c0_i32, %c0_i32_0 : i32, i32
  }
  func.func @transform_17(%arg0: i32) -> (i32, i32) {
    %c0_i32 = arith.constant 0 : i32
    %c0_i32_0 = arith.constant 0 : i32
    %c0_i32_1 = arith.constant 0 : i32
    return %c0_i32, %c0_i32_0 : i32, i32
  }
  func.func @transform_18(%arg0: i32) -> (i32, i32) {
    %c0_i32 = arith.constant 0 : i32
    %c0_i32_0 = arith.constant 0 : i32
    %c0_i32_1 = arith.constant 0 : i32
    return %c0_i32, %c0_i32_0 : i32, i32
  }
  func.func @transform_19(%arg0: i32) -> (i32, i32) {
    %c0_i32 = arith.constant 0 : i32
    %c0_i32_0 = arith.constant 0 : i32
    %c0_i32_1 = arith.constant 0 : i32
    return %c0_i32, %c0_i32_0 : i32, i32
  }
  func.func @transform_20(%arg0: i32) -> (i32, i32) {
    %c0_i32 = arith.constant 0 : i32
    %c0_i32_0 = arith.constant 0 : i32
    %c0_i32_1 = arith.constant 0 : i32
    return %c0_i32, %c0_i32_0 : i32, i32
  }
  func.func @transform_21(%arg0: i32) -> (i32, i32) {
    %c0_i32 = arith.constant 0 : i32
    %c0_i32_0 = arith.constant 0 : i32
    %c0_i32_1 = arith.constant 0 : i32
    return %c0_i32, %c0_i32_0 : i32, i32
  }
  func.func @transform_22(%arg0: i32) -> (i32, i32) {
    %c0_i32 = arith.constant 0 : i32
    %c0_i32_0 = arith.constant 0 : i32
    %c0_i32_1 = arith.constant 0 : i32
    return %c0_i32, %c0_i32_0 : i32, i32
  }
  func.func @transform_23(%arg0: i32) -> (i32, i32) {
    %c0_i32 = arith.constant 0 : i32
    %c0_i32_0 = arith.constant 0 : i32
    %c0_i32_1 = arith.constant 0 : i32
    return %c0_i32, %c0_i32_0 : i32, i32
  }
  func.func @transform_24(%arg0: i32) -> (i32, i32) {
    %c0_i32 = arith.constant 0 : i32
    %c0_i32_0 = arith.constant 0 : i32
    %c0_i32_1 = arith.constant 0 : i32
    return %c0_i32, %c0_i32_0 : i32, i32
  }
  func.func @transform_25(%arg0: i32) -> (i32, i32, i32) {
    %c0_i32 = arith.constant 0 : i32
    %c0_i32_0 = arith.constant 0 : i32
    %c0_i32_1 = arith.constant 0 : i32
    return %arg0, %c0_i32, %c0_i32_0 : i32, i32, i32
  }
}

</mosaic_0001>

<bundles_post_ra>
// kernel: model_forward.1
= control target key start
LH: loop header
LB: loop body
LE: loop exit
PB: predicated region body
PF: predicated region fallthrough
CT: control target
= control target key end

     0   :  { %s2875_s0 = inlined_call_operand.vmem [shape: f32[2,8,8], index: 0, kind: input, shape index: {}]   ;;  %s2876_s1 = inlined_call_operand.vmem [shape: f32[2,1,8], index: 1, kind: input, shape index: {}]   ;;  %s2877_s2 = inlined_call_operand.vmem [shape: f32[2,8,1], index: 2, kind: input, shape index: {}]   ;;  %s2878_s3 = inlined_call_operand.vmem [shape: f32[24,8], index: 3, kind: input, shape index: {}]   ;;  %s2879_s4 = inlined_call_operand.vmem [shape: f32[1,8], index: 4, kind: input, shape index: {}]   ;;  %s2880_s5 = inlined_call_operand.vmem [shape: f32[40,8], index: 5, kind: input, shape index: {}]   ;;  %s2881_s6 = inlined_call_operand.vmem [shape: f32[1,8], index: 6, kind: input, shape index: {}]   ;;  %s2882_s7 = inlined_call_operand.vmem [shape: f32[24,8], index: 7, kind: input, shape index: {}]   ;;  %s2883_s8 = inlined_call_operand.vmem [shape: f32[1,8], index: 8, kind: input, shape index: {}]   ;;  %s2884_s9 = inlined_call_operand.vmem [shape: f32[40,8], index: 9, kind: input, shape index: {}]   ;;  %s2885_s10 = inlined_call_operand.vmem [shape: f32[1,8], index: 10, kind: input, shape index: {}]   ;;  %s2886_s11 = inlined_call_operand.vmem [shape: f32[24,16], index: 11, kind: input, shape index: {}]   ;;  %s2887_s12 = inlined_call_operand.vmem [shape: f32[1,16], index: 12, kind: input, shape index: {}]   ;;  %s2888_s13 = inlined_call_operand.vmem [shape: f32[1,16], index: 13, kind: input, shape index: {}]   ;;  %s2889_s14 = inlined_call_operand.vmem [shape: f32[1,16], index: 14, kind: input, shape index: {}]   ;;  %s2890_s15 = inlined_call_operand.vmem [shape: f32[16,16], index: 15, kind: input, shape index: {}]   ;;  %s2891_s16 = inlined_call_operand.vmem [shape: f32[1,16], index: 16, kind: input, shape index: {}]   ;;  %s2892_s17 = inlined_call_operand.vmem [shape: f32[1,16], index: 17, kind: input, shape index: {}]   ;;  %s2893_s18 = inlined_call_operand.vmem [shape: f32[1,16], index: 18, kind: input, shape index: {}]   ;;  %s2894_s19 = inlined_call_operand.vmem [shape: f32[16,16], index: 19, kind: input, shape index: {}]   ;;  %s2895_s20 = inlined_call_operand.vmem [shape: f32[1,16], index: 20, kind: input, shape index: {}]   ;;  %s2896_s21 = inlined_call_operand.vmem [shape: f32[1,16], index: 21, kind: input, shape index: {}]   ;;  %s2897_s22 = inlined_call_operand.vmem [shape: f32[1,16], index: 22, kind: input, shape index: {}]   ;;  %s2898_s23 = inlined_call_operand.vmem [shape: f32[16,3], index: 23, kind: input, shape index: {}]   ;;  %s2899_s24 = inlined_call_operand.vmem [shape: f32[1,3], index: 24, kind: input, shape index: {}]   ;;  %s2900_s25 = inlined_call_operand.hbm [shape: f32[2,1,3], index: 25, kind: output, shape index: {}]  }
   0x1   :  { %2915 = sst [smem:[#allocation12_spill]] %s2875_s0 }
   0x2   :  { %2916 = sst [smem:[#allocation13_spill]] %s2876_s1 }
   0x3   :  { %2917 = sst [smem:[#allocation14_spill]] %s2877_s2 }
   0x4   :  { %2918 = sst [smem:[#allocation15_spill]] %s2878_s3 }
   0x5   :  { %2919 = sst [smem:[#allocation16_spill]] %s2879_s4 }
   0x6   :  { %2920 = sst [smem:[#allocation17_spill]] %s2880_s5 }
   0x7   :  { %2921 = sst [smem:[#allocation18_spill]] %s2881_s6 }
   0x8   :  { %2922 = sst [smem:[#allocation19_spill]] %s2882_s7 }
   0x9   :  { %2923 = sst [smem:[#allocation20_spill]] %s2883_s8 }
   0xa   :  { %2924 = sst [smem:[#allocation21_spill]] %s2884_s9 }
   0xb   :  { %2925 = sst [smem:[#allocation22_spill]] %s2885_s10 }
   0xc   :  { %2926 = sst [smem:[#allocation23_spill]] %s2886_s11 }
   0xd   :  { %2927 = sst [smem:[#allocation24_spill]] %s2887_s12 }
   0xe   :  { %30 = vsyncpa [#allocation3], 0 }
   0xf   :  { %32 = vsyncpa [#allocation3 + $0x1], 0  ;;  %s2519_s29 = smov 0   ;;  %s2521_s2 = smov 0  }
  0x10   :  { %s2523_s6 = smov 0   ;;  %s2525_s30 = smov 0  }
  0x11 LB: > { %2928 = sst [smem:[#allocation5_spill]] %s2369_s29  ;;  %s2540_s7 = sadd.s32 4294967295, %s2381_s30   ;;  %s2381_s30 = sphi %s2525_s30, %s2954_s30   ;;  %s2377_s6 = sphi %s2523_s6, %s2956_s6   ;;  %s2373_s2 = sphi %s2521_s2, %s2958_s2   ;;  %s2369_s29 = sphi %s2519_s29, %s2957_s29  }
  0x12   : > { %2929 = sst [smem:[#allocation6_spill]] %s2377_s6  ;;  %s2165_s3 = sadd.s32 4294967294, %s2381_s30  }
  0x13   : > { %2930 = sst [smem:[#allocation7_spill]] %s2381_s30  ;;  %s2544_s26 = sadd.s32 1, %s2381_s30  }
  0x14   : > { %2931 = sst [smem:[#allocation8_spill]] %s2544_s26  ;;  %s585_s1 = sadd.s32 1, %s2377_s6 }
  0x15   : > { %s582_s8 = ssub.s32 %s2381_s30, %s2544_s26  ;;  %p595_p0 = scmp.ne.s32.totalorder %s2377_s6, %s2373_s2 }
  0x16   : > { %p583_p1 = scmp.eq.s32.totalorder %s582_s8, 0  ;;  %p596_p2 = scmp.eq.s32.totalorder %s2540_s7, 1 }
  0x17   : > { %p601_p3 = scmp.ne.s32.totalorder %s2373_s2, %s2369_s29  ;;  %p602_p4 = scmp.eq.s32.totalorder %s2165_s3, 1 }
  0x18   : > { %s2555_s27 = scalar_select %p583_p1, %s2377_s6, %s585_s1  }
  0x19   : > { %p2557_p5 = por %p596_p2, %p595_p0  ;;  %p2561_p6 = por %p602_p4, %p601_p3 }
  0x1a   : > { %2932 = sst [smem:[#allocation9_spill]] %s2555_s27  ;;  %p2168_p7 = scmp.ge.s32.totalorder %s2381_s30, 1 }
  0x1b   : > { %s2933_s4 = scalar_select %p2557_p5, 1, 0 }
  0x1c   : > { %s2935_s28 = scalar_select %p2561_p6, 1, 0 }
  0x1d   : > { %2934 = sst [smem:[#allocation10_spill]] %s2933_s4  ;;  %p706_p8 = scmp.lt.s32.totalorder %s2381_s30, 3 }
  0x1e   : > { %2936 = sst [smem:[#allocation11_spill]] %s2935_s28 }
  0x1f   : > { %p707_p9 = pnand %p2168_p7, %p706_p8 }
  0x20   : > { %p779_p10 = scmp.lt.s32.totalorder (!%p707_p9), %s2540_s7, 1  ;;  %s2937_s1 = sld [smem:[#allocation12_spill]] (!%p707_p9) }
  0x21   : > { %710 = sbr.rel (%p707_p9) target bundleno = 4547 (0x11c3), region = 120  ;;  %s2939_s28 = sld [smem:[#allocation14_spill]] (!%p707_p9) }
  0x22   : > { %s2940_s3 = sld [smem:[#allocation19_spill]] (!%p707_p9) }
  0x23   : > { %s2941_s30 = sld [smem:[#allocation16_spill]] (!%p707_p9) }
  0x24   : > { %s2943_s0 = sld [smem:[#allocation20_spill]] (!%p707_p9) }
  0x25   : > { %s2944_s26 = sld [smem:[#allocation21_spill]] (!%p707_p9) }
  0x26   : > { %v793_v0 = vlaneseq  ;;  %s2569_s9 = scalar_select %p779_p10, %s2540_s7, 1  ;;  %vm814_vm0 = vcmask 64512   ;;  %v2383_v6 = vmov 0.0   ;;  %v2384_v13 = vmov 0  }
  0x27   : > { %2266 = vset.pattern.permute.xlu0 %v2384_v13  ;;  %s2946_s11 = sld [smem:[#allocation23_spill]]  ;;  %vm1459_vm9 = vcmask 130048   ;;  %vm1468_vm10 = vcmask 195584   ;;  %vm1567_vm13 = vcmask 57344  }
  0x28   : > { %v2571_v1 = vshrl.u32 %v793_v0, 7  ;;  %v2573_v2 = vand.u32 127, %v793_v0  ;;  %s2169_s5 = sshll.u32 %s2569_s9, 3  ;;  %v968_v16 = vld [vmem:[%s2940_s3 + $0x8] sm:$0xff]  ;;  %v947_v31 = vld [vmem:[%s2940_s3] sm:$0xff]  ;;  %v1015_v32 = vld [vmem:[%s2940_s3 + $0x10] sm:$0xff] }
  0x29   : > { %s782_s8 = scalar_lea.vmem %s2937_s1, %s2169_s5  ;;  %s2938_s1 = sld [smem:[#allocation15_spill]]  ;;  %v2267_v21 = vld [vmem:[%s2941_s30] ss:$0 sm:$0xff] }
  0x2a   : > { %v801_v3 = vadd.s32 4294967295, %v2571_v1  ;;  %v805_v4 = vadd.s32 1, %v2571_v1  ;;  %v2581_v5 = vld [vmem:[%s782_s8] sm:$0xff]  ;;  %s789_s29 = scalar_lea.vmem %s2939_s28, %s2169_s5  ;;  %v797_v27 = vadd.s32 4294967294, %v2571_v1  ;;  %s2942_s28 = sld [smem:[#allocation17_spill]]  ;;  %v809_v39 = vadd.s32 2, %v2571_v1 }
  0x2b   : > { %833 = vmatpush.msra.mxu0 %v2581_v5  ;;  %904 = vmatpush.msra.mxu3 %v2581_v5  ;;  %v792_v12 = vld [vmem:[%s789_s29] sm:$0xff]  ;;  %s2385_s29 = smov 8   ;;  %s2945_s5 = sld [smem:[#allocation18_spill]] }
  0x2c   : > { %vm802_vm1 = vcmp.eq.s32.totalorder %v2573_v2, %v801_v3  ;;  %vm806_vm2 = vcmp.eq.s32.totalorder %v2573_v2, %v805_v4  ;;  %940 = vperm.xlu0 %2266, %v792_v12   ;;  %vm798_vm4 = vcmp.eq.s32.totalorder %v2573_v2, %v797_v27  ;;  %vm810_vm5 = vcmp.eq.s32.totalorder %v2573_v2, %v809_v39  ;;  %v2268_v46 = vld [vmem:[%s2943_s0] ss:$0 sm:$0xff]  ;;  %v1326_v4 = vld [vmem:[%s2944_s26 + $0x10] sm:$0xff]  ;;  %s2947_s10 = sld [smem:[#allocation22_spill]]  ;;  %s2388_s8 = smov 120  }
  0x2d   : > { %v2587_v7 = vsel %vm802_vm1, 1.0, %v2383_v6  ;;  %v2591_v8 = vsel %vm806_vm2, 1.0, %v2383_v6  ;;  %v2634_v30 = vsel %vm798_vm4, 1.0, %v2383_v6  ;;  %1010 = vmatpush.msrb.mxu3 %v947_v31  ;;  %v2174_v41 = vsel %vm810_vm5, 1.0, %v2383_v6  ;;  %v1238_v54 = vld [vmem:[%s2944_s26] sm:$0xff]  ;;  %s2948_s12 = sld [smem:[#allocation24_spill]]  ;;  %s2085_s0 = scalar_lea.hbm %s2900_s25, %s2540_s7 }
  0x2e   : > { %2175 = vmatmul.msk.f32.vlgmr.msra.gmra.mxu0 %vm814_vm0, %v2587_v7  ;;  %2178 = vmatmul.msk.f32.vlgmr.msra.gmra.mxu3 %vm814_vm0, %v2591_v8  ;;  %v1461_v31 = vld [vmem:[%s2946_s11] sm:$0xff]  ;;  %s2949_s4 = sld [smem:[#allocation13_spill]] }
  0x2f   : > { %v813_v9 = vld [vmem:[%s2938_s1] sm:$0xff]  ;;  %v838_v10 = vld [vmem:[%s2938_s1 + $0x8] sm:$0xff]  ;;  %v885_v11 = vld [vmem:[%s2938_s1 + $0x10] sm:$0xff]  ;;  %s2386_s1 = smov 16  }
  0x30   : > { %880 = vmatpush.msra.mxu2 %v813_v9  ;;  %857 = vmatpush.msra.mxu1 %v838_v10  ;;  %v1159_v29 = vld [vmem:[%s2942_s28 + $0x18] sm:$0xff]  ;;  %v1093_v33 = vld [vmem:[%s2942_s28 + $0x8] sm:$0xff]  ;;  %v1069_v34 = vld [vmem:[%s2942_s28] sm:$0xff] }
  0x31   : > { %2176 = vmatmul.msk.f32.vlgmr.msra.gmra.mxu1 %vm814_vm0, %v2581_v5  ;;  %927 = vmatpush.msrb.mxu0 %v885_v11  ;;  %v1137_v35 = vld [vmem:[%s2942_s28 + $0x10] sm:$0xff]  ;;  %v1181_v42 = vld [vmem:[%s2942_s28 + $0x20] sm:$0xff]  ;;  %v1259_v9 = vld [vmem:[%s2944_s26 + $0x8] sm:$0xff] }
  0x32   : > { %987 = vmatpush.msrb.mxu2 %v968_v16  ;;  %1109 = vmatpush.msra.mxu3 %v1093_v33  ;;  %v2269_v61 = vld [vmem:[%s2945_s5] ss:$0 sm:$0xff]  ;;  %v1351_v10 = vld [vmem:[%s2944_s26 + $0x18] sm:$0xff]  ;;  %v1462_v16 = vld [vmem:[%s2946_s11 + $0x8] sm:$0xff] }
  0x9e   : > { %v2620_v23 = vpop.permute.xlu0 %940 }
  0xab   : > { %v835_v14 = vpop.f32.mrf.mxu0 }
  0xac   : > { %2177 = vmatmul.msk.f32.vlgmr.msra.gmra.mxu2 %vm814_vm0, %v835_v14 }
  0xad   : > { %1088 = vmatpush.msra.mxu2 %v2581_v5 }
  0xae   : > { %v859_v17 = vpop.f32.mrf.mxu1 }
  0xb1   : > { %v906_v15 = vpop.f32.mrf.mxu3 }
  0xb2   : > { %2179 = vmatmul.msk.f32.vlgmr.msrb.gmra.mxu0 %vm814_vm0, %v906_v15 }
 0x12f   : > { %v882_v18 = vpop.f32.mrf.mxu2  ;;  %v929_v19 = vpop.f32.mrf.mxu0 }
 0x130   : > { %v883_v20 = vadd.f32 %v882_v18, %v859_v17 }
 0x132   : > { %v932_v22 = vadd.f32 %v929_v19, %v883_v20 }
 0x134   : > { %v937_v24 = vadd.f32 %v2267_v21, %v932_v22 }
 0x136   : > { %v943_v25 = vmul.f32 %v2620_v23, %v937_v24  ;;  %v2270_v24 = vld [vmem:[%s2947_s10] ss:$0 sm:$0xff] }
 0x138   : > { %vm944_vm3 = vcmp.ge.f32.partialorder %v943_v25, 0.0  ;;  %v945_v26 = vmul.f32 0.01, %v943_v25 }
 0x13a   : > { %v946_v28 = vsel %vm944_vm3, %v943_v25, %v945_v26 }
 0x13b   : > { %963 = vmatpush.msrb.mxu1 %v946_v28  ;;  %2181 = vmatmul.msk.f32.vlgmr.msrb.gmra.mxu2 %vm814_vm0, %v946_v28 }
 0x13c   : > { %1031 = vmatpush.msra.mxu0 %v946_v28  ;;  %2180 = vmatmul.msk.f32.vlgmr.msrb.gmra.mxu1 %vm814_vm0, %v2587_v7 }
 0x13d   : > { %2183 = vmatmul.msk.f32.vlgmr.msra.gmra.mxu0 %vm814_vm0, %v2591_v8  ;;  %1175 = vmatpush.msrb.mxu2 %v1159_v29 }
 0x13e   : > { %1054 = vmatpush.msra.mxu1 %v1015_v32  ;;  %1132 = vmatpush.msrb.mxu0 %v1069_v34 }
 0x140   : > { %1153 = vmatpush.msrb.mxu1 %v1137_v35  ;;  %1223 = vmatpush.msra.mxu0 %v1181_v42  ;;  %v2387_v42 = vmov 16.0  }
 0x141   : > { %2275 = vrcp.f32 %v2387_v42 }
 0x143   : > { %2185 = vmatmul.msk.f32.vlgmr.msra.gmra.mxu2 %vm814_vm0, %v2634_v30 }
 0x14b   : > { %2189 = vmatmul.msk.f32.vlgmr.msrb.gmra.mxu2 %vm814_vm0, %v906_v15  ;;  %v1463_v15 = vld [vmem:[%s2946_s11 + $0x10] sm:$0xff] }
 0x1b9   : > { %v965_v36 = vpop.f32.mrf.mxu1 }
 0x1ba   : > { %2182 = vmatmul.msk.f32.vlgmr.msrb.gmra.mxu3 %vm814_vm0, %v965_v36  ;;  %v1033_v37 = vpop.f32.mrf.mxu0  ;;  %v2271_v36 = vld [vmem:[%s2948_s12] ss:$0 sm:$0xff] }
 0x1bb   : > { %2184 = vmatmul.msk.f32.vlgmr.msra.gmra.mxu1 %vm814_vm0, %v1033_v37  ;;  %1200 = vmatpush.msrb.mxu3 %v2581_v5 }
 0x1be   : > { %v989_v38 = vpop.f32.mrf.mxu2 }
 0x1c2   : > { %2186 = vmatmul.msk.f32.vlgmr.msra.gmra.mxu3 %vm814_vm0, %v835_v14 }
 0x1c3   : > { %2188 = vmatmul.msk.f32.vlgmr.msrb.gmra.mxu1 %vm814_vm0, %v2581_v5  ;;  %1298 = vmatpush.msra.mxu3 %v1259_v9 }
 0x1c6   : > { %v1090_v40 = vpop.f32.mrf.mxu2 }
 0x1c7   : > { %2187 = vmatmul.msk.f32.vlgmr.msrb.gmra.mxu0 %vm814_vm0, %v1090_v40 }
 0x1c8   : > { %1321 = vmatpush.msrb.mxu0 %v1238_v54 }
 0x1ca   : > { %2190 = vmatmul.msk.f32.vlgmr.msrb.gmra.mxu3 %vm814_vm0, %v2174_v41 }
 0x1cb   : > { %1390 = vmatpush.msrb.mxu3 %v1351_v10  ;;  %v2272_v10 = vld [vmem:[%s2888_s13] ss:$0 sm:$0xff] }
 0x1ce   : > { %v1177_v59 = vpop.f32.mrf.mxu2 }
 0x238   : > { %v1056_v44 = vpop.f32.mrf.mxu1 }
 0x23d   : > { %v1012_v43 = vpop.f32.mrf.mxu3 }
 0x23e   : > { %v1013_v45 = vadd.f32 %v1012_v43, %v989_v38 }
 0x240   : > { %v1059_v47 = vadd.f32 %v1056_v44, %v1013_v45  ;;  %v1155_v57 = vpop.f32.mrf.mxu1 }
 0x242   : > { %v1064_v48 = vadd.f32 %v2268_v46, %v1059_v47 }
 0x244   : > { %v1065_v49 = vmul.f32 %v1064_v48, %v2620_v23  ;;  %v1134_v55 = vpop.f32.mrf.mxu0 }
 0x245   : > { %v1111_v50 = vpop.f32.mrf.mxu3 }
 0x246   : > { %vm1066_vm6 = vcmp.ge.f32.partialorder %v1065_v49, 0.0  ;;  %v1067_v51 = vmul.f32 0.01, %v1065_v49  ;;  %v1135_v56 = vadd.f32 %v1134_v55, %v1111_v50  ;;  %v1534_v55 = vld [vmem:[%s2890_s15 + $0x8] sm:$0xff] }
 0x248   : > { %v1068_v52 = vsel %vm1066_vm6, %v1065_v49, %v1067_v51  ;;  %v1158_v58 = vadd.f32 %v1155_v57, %v1135_v56  ;;  %v1533_v56 = vld [vmem:[%s2890_s15] sm:$0xff] }
 0x249   : > { %1451 = vrot.lane.b32.xlu0 %v1068_v52, %s2385_s29 }
 0x24a   : > { %v1180_v60 = vadd.f32 %v1177_v59, %v1158_v58 }
 0x24d   : > { %v1202_v53 = vpop.f32.mrf.mxu3 }
 0x24e   : > { %2191 = vmatmul.msk.f32.vlgmr.msra.gmra.mxu0 %vm814_vm0, %v1202_v53 }
 0x2bb   : > { %v1452_v32 = vpop.permute.xlu0 %1451 }
 0x2bc   : > { %v1458_v33 = vsel %vm814_vm0, %v2581_v5, %v1452_v32  ;;  %v2276_v5 = vpop.eup %2275 }
 0x2bd   : > { %v1500_v43 = vmul.f32 16.0, %v2276_v5  ;;  %vm1504_vm11 = vweird.f32 %v2276_v5 }
 0x2bf   : > { %v1501_v44 = vsub.f32 1.0, %v1500_v43 }
 0x2c1   : > { %v1502_v45 = vmul.f32 %v2276_v5, %v1501_v44 }
 0x2c3   : > { %v1503_v46 = vadd.f32 %v2276_v5, %v1502_v45 }
 0x2c5   : > { %v2726_v47 = vsel %vm1504_vm11, %v2276_v5, %v1503_v46 }
 0x2cb   : > { %v1225_v62 = vpop.f32.mrf.mxu0 }
 0x2cc   : > { %v1228_v63 = vadd.f32 %v1225_v62, %v1180_v60 }
 0x2ce   : > { %v1233_v0 = vadd.f32 %v2269_v61, %v1228_v63 }
 0x2d0   : > { %v1234_v1 = vmul.f32 %v1233_v0, %v2620_v23 }
 0x2d2   : > { %v1236_v2 = vmul.f32 0.01, %v1234_v1  ;;  %vm1235_vm7 = vcmp.ge.f32.partialorder %v1234_v1, 0.0 }
 0x2d4   : > { %v1237_v3 = vsel %vm1235_vm7, %v1234_v1, %v1236_v2 }
 0x2d5   : > { %1254 = vmatpush.msra.mxu1 %v1237_v3  ;;  %1275 = vmatpush.msra.mxu2 %v1237_v3 }
 0x2d6   : > { %1412 = vmatpush.msra.mxu0 %v1237_v3  ;;  %2192 = vmatmul.msk.f32.vlgmr.msra.gmra.mxu1 %vm814_vm0, %v2634_v30 }
 0x2d7   : > { %2193 = vmatmul.msk.f32.vlgmr.msra.gmra.mxu2 %vm814_vm0, %v2587_v7  ;;  %1345 = vmatpush.msrb.mxu1 %v1326_v4 }
 0x2d8   : > { %1367 = vmatpush.msrb.mxu2 %v1237_v3 }
 0x2da   : > { %1485 = vmatpush.msra.mxu2 %v1463_v15 }
 0x2dc   : > { %1486 = vmatpush.msra.mxu2 %v1462_v16 }
 0x2de   : > { %2196 = vmatmul.msk.f32.vlgmr.msrb.gmra.mxu1 %vm814_vm0, %v1237_v3  ;;  %1487 = vmatpush.msra.mxu2 %v1461_v31 }
 0x2df   : > { %2197 = vmatmul.msk.f32.vlgmr.msrb.gmra.mxu2 %vm814_vm0, %v2591_v8  ;;  %v1396_v8 = vld [vmem:[%s2944_s26 + $0x20] sm:$0xff] }
 0x2e0   : > { %1435 = vmatpush.msra.mxu1 %v1396_v8 }
 0x353   : > { %v1256_v11 = vpop.f32.mrf.mxu1 }
 0x354   : > { %2195 = vmatmul.msk.f32.vlgmr.msrb.gmra.mxu0 %vm814_vm0, %v1256_v11 }
 0x35a   : > { %v1277_v7 = vpop.f32.mrf.mxu2 }
 0x35b   : > { %2194 = vmatmul.msk.f32.vlgmr.msra.gmra.mxu3 %vm814_vm0, %v1277_v7  ;;  %v1347_v18 = vpop.f32.mrf.mxu1 }
 0x35c   : > { %2199 = vmatmul.msk.f32.vlgmr.msra.gmra.mxu0 %vm814_vm0, %v2174_v41  ;;  %1556 = vmatpush.msra.mxu3 %v1534_v55 }
 0x35e   : > { %1557 = vmatpush.msra.mxu3 %v1533_v56 }
 0x362   : > { %v1369_v12 = vpop.f32.mrf.mxu2 }
 0x363   : > { %2198 = vmatmul.msk.f32.vlgmr.msrb.gmra.mxu3 %vm814_vm0, %v1369_v12  ;;  %v2273_v12 = vld [vmem:[%s2889_s14] ss:$0 sm:$0xff] }
 0x3d1   : > { %v1323_v13 = vpop.f32.mrf.mxu0 }
 0x3d9   : > { %v1414_v14 = vpop.f32.mrf.mxu0 }
 0x3da   : > { %2200 = vmatmul.msk.f32.vlgmr.msra.gmra.mxu1 %vm814_vm0, %v1414_v14 }
 0x3de   : > { %v1300_v17 = vpop.f32.mrf.mxu3 }
 0x3df   : > { %v1324_v19 = vadd.f32 %v1323_v13, %v1300_v17 }
 0x3e1   : > { %v1350_v21 = vadd.f32 %v1347_v18, %v1324_v19 }
 0x3e6   : > { %v1392_v20 = vpop.f32.mrf.mxu3 }
 0x3e7   : > { %v1395_v22 = vadd.f32 %v1392_v20, %v1350_v21 }
 0x457   : > { %v1437_v25 = vpop.f32.mrf.mxu1 }
 0x458   : > { %v1440_v26 = vadd.f32 %v1437_v25, %v1395_v22  ;;  %v2274_v25 = vld [vmem:[%s2891_s16] ss:$0 sm:$0xff] }
 0x45a   : > { %v1445_v27 = vadd.f32 %v2270_v24, %v1440_v26 }
 0x45c   : > { %v1446_v28 = vmul.f32 %v1445_v27, %v2620_v23 }
 0x45e   : > { %vm1447_vm8 = vcmp.ge.f32.partialorder %v1446_v28, 0.0  ;;  %v1448_v29 = vmul.f32 0.01, %v1446_v28 }
 0x460   : > { %v1449_v30 = vsel %vm1447_vm8, %v1446_v28, %v1448_v29 }
 0x461   : > { %1455 = vrot.lane.b32.xlu1 %v1449_v30, %s2386_s1  ;;  %s785_s1 = scalar_lea.vmem %s2949_s4, %s2569_s9  ;;  %s777_s9 = sand.u32 1, %s2373_s2  }
 0x462   : > { %v2733_v50 = vld [vmem:[%s785_s1] sm:$0x1]  ;;  %s778_s30 = scalar_lea.vmem [#allocation2], %s777_s9  ;;  %s2089_s1 = sshll.u32 %s2085_s0, 4  ;;  %s2090_s1 = int_to_ptr.hbm [resolvable:$true] %s2089_s1 }
 0x463   : > { %vm1565_vm12 = vcmp.eq.f32.partialorder %v2733_v50, 0.0  ;;  %s2087_s4 = sshll.u32 %s778_s30, 4  ;;  %s2077_s5 = scalar_lea.sflag [#allocation3], %s777_s9  ;;  %s2088_s4 = int_to_ptr.vmem [resolvable:$true] %s2087_s4 }
 0x464   : > { %v1566_v53 = vsel %vm1565_vm12, -1e+20, %v2383_v6  ;;  %s2339_s0 = scalar_lea.hbm %s2900_s25, 2 }
 0x465   : > { %v1568_v54 = vsel %vm1567_vm13, %v1566_v53, -inf }
 0x4d3   : > { %v1456_v34 = vpop.permute.xlu1 %1455 }
 0x4d4   : > { %v1460_v35 = vsel %vm1459_vm9, %v1458_v33, %v1456_v34 }
 0x4d5   : > { %2201 = vmatmul.msk.f32.vlgmr.msra.gmra.mxu2 %vm1468_vm10, %v1460_v35 }
 0x558   : > { %v1489_v37 = vpop.f32.mrf.mxu2 }
 0x559   : > { %v1490_v38 = vadd.f32 %v2271_v36, %v1489_v37 }
 0x55b   : > { %v1492_v39 = vmul.f32 %v1490_v38, %v2620_v23 }
 0x55d   : > { %v1493_v40 = vmax.f32 %v1492_v39, 0.0 }
 0x55f   : > { %v1496_v41 = vsel %vm1459_vm9, %v1493_v40, 0.0 }
 0x560   : > { %1497 = vadd.xlane.f32.xlu1 %v1496_v41 }
 0x5d3   : > { %v1498_v48 = vpop.xlane.xlu1 %1497 }
 0x5d4   : > { %v1506_v49 = vmul.f32 %v2726_v47, %v1498_v48 }
 0x5d6   : > { %v1507_v23 = vsub.f32 %v1493_v40, %v1506_v49 }
 0x5d8   : > { %v1508_v51 = vmul.f32 %v1507_v23, %v1507_v23 }
 0x5da   : > { %v1509_v52 = vsel %vm1459_vm9, %v1508_v51, 0.0 }
 0x5db   : > { %1510 = vadd.xlane.f32.xlu2 %v1509_v52 }
 0x5e3   : > { %1569 = vmax.xlane.f32.xlu2 %v1568_v54 }
 0x64e   : > { %v1511_v57 = vpop.xlane.xlu2 %1510 }
 0x64f   : > { %v1512_v58 = vmul.f32 %v1511_v57, %v2726_v47 }
 0x651   : > { %v1513_v59 = vadd.f32 1e-05, %v1512_v58 }
 0x653   : > { %2277 = vrsqrt.f32 %v1513_v59  ;;  %vm1520_vm15 = vweird.f32 %v1513_v59 }
 0x656   : > { %v1570_v6 = vpop.xlane.xlu2 %1569 }
 0x657   : > { %v1571_v60 = vsub.f32 %v1566_v53, %v1570_v6 }
 0x659   : > { %v2278_v61 = vpop.eup %2277  ;;  %v1572_v62 = vmul.f32 1.442695, %v1571_v60 }
 0x65a   : > { %v1515_v63 = vmul.f32 %v2278_v61, %v1513_v59  ;;  %vm1521_vm14 = vweird.f32 %v2278_v61 }
 0x65b   : > { %2279 = vpow2.f32 %v1572_v62  ;;  %vm1522_vm1 = vmor %vm1520_vm15, %vm1521_vm14 }
 0x65c   : > { %v1516_v0 = vmul.f32 %v2278_v61, %v1515_v63 }
 0x65e   : > { %v1517_v1 = vmul.f32 0.5, %v1516_v0 }
 0x660   : > { %v1518_v2 = vsub.f32 1.5, %v1517_v1 }
 0x661   : > { %v2280_v3 = vpop.eup %2279 }
 0x662   : > { %v1519_v4 = vmul.f32 %v2278_v61, %v1518_v2  ;;  %v1574_v9 = vsel %vm1567_vm13, %v2280_v3, 0.0 }
 0x663   : > { %1575 = vadd.xlane.f32.xlu0 %v1574_v9 }
 0x664   : > { %v1523_v11 = vsel %vm1522_vm1, %v2278_v61, %v1519_v4 }
 0x665   : > { %v1524_v7 = vmul.f32 %v1523_v11, %v1507_v23 }
 0x667   : > { %v1528_v8 = vmul.f32 %v2272_v10, %v1524_v7 }
 0x669   : > { %v1532_v13 = vadd.f32 %v2273_v12, %v1528_v8 }
 0x66b   : > { %2202 = vmatmul.msk.f32.vlgmr.msra.gmra.mxu3 %vm1459_vm9, %v1532_v13 }
 0x6d6   : > { %v1576_v14 = vpop.xlane.xlu0 %1575 }
 0x6d7   : > { %2281 = vrcp.f32 %v1576_v14  ;;  %vm1582_vm2 = vweird.f32 %v1576_v14  ;;  %v1588_v20 = vand.u32 2147483648, %v1576_v14  ;;  %v1586_v21 = vand.u32 2147483647, %v1576_v14 }
 0x6d9   : > { %v1589_v24 = vor.u32 1.1754944e-38, %v1588_v20  ;;  %vm1587_vm5 = vcmp.eq.f32.partialorder %v1586_v21, 8.507059e+37 }
 0x6dd   : > { %v2282_v15 = vpop.eup %2281 }
 0x6de   : > { %v1578_v16 = vmul.f32 %v2282_v15, %v1576_v14  ;;  %vm1583_vm3 = vweird.f32 %v2282_v15 }
 0x6df   : > { %vm1584_vm4 = vmor %vm1582_vm2, %vm1583_vm3 }
 0x6e0   : > { %v1579_v17 = vsub.f32 1.0, %v1578_v16 }
 0x6e2   : > { %v1580_v18 = vmul.f32 %v2282_v15, %v1579_v17 }
 0x6e4   : > { %v1581_v19 = vadd.f32 %v2282_v15, %v1580_v18 }
 0x6e6   : > { %v1585_v22 = vsel %vm1584_vm4, %v2282_v15, %v1581_v19 }
 0x6e7   : > { %v1590_v26 = vsel %vm1587_vm5, %v1589_v24, %v1585_v22 }
 0x6e8   : > { %v1591_v29 = vmul.f32 %v2280_v3, %v1590_v26 }
 0x6ea   : > { %v1592_v32 = vmul.f32 %v1591_v29, %v2733_v50 }
 0x6ee   : > { %v1559_v27 = vpop.f32.mrf.mxu3 }
 0x6ef   : > { %v1560_v28 = vadd.f32 %v2274_v25, %v1559_v27 }
 0x6f1   : > { %vm1562_vm6 = vcmp.ge.f32.partialorder %v1560_v28, 0.0  ;;  %v1563_v30 = vmul.f32 0.01, %v1560_v28 }
 0x6f3   : > { %v1564_v31 = vsel %vm1562_vm6, %v1560_v28, %v1563_v30 }
 0x6f4   : > { %1767 = vrot.lane.b32.xlu2 %v1564_v31, %s2388_s8  ;;  %1611 = vmatpush.msrb.mxu0 %v1564_v31  ;;  %s2333_s8 = sshra.s32 %s2090_s1, 4  ;;  %s2334_s8 = int_to_ptr.hbm [resolvable:$true] %s2333_s8 }
 0x6f5   : > { %2204 = vmatpush.xpose.msk.msrb.mxu1 %vm814_vm0, %v1564_v31  ;;  %1687 = vmatpush.msrb.mxu2 %v1564_v31  ;;  %s2335_s7 = scalar_lea.hbm %s2334_s8, 1  ;;  %p2340_p0 = scmp.lt.s32.totalorder %s2334_s8, %s2900_s25 }
 0x6f6   : > { %2207 = vmatpush.xpose.msk.msrb.mxu3 %vm814_vm0, %v1564_v31  ;;  %2203 = vmatmul.msk.f32.vlgmr.msrb.gmra.mxu0 %vm814_vm0, %v1592_v32  ;;  %p2336_p11 = scmp.ne.s32.totalorder %s2334_s8, %s2335_s7  ;;  %p2341_p1 = scmp.lt.s32.totalorder %s2339_s0, %s2335_s7 }
 0x6f7   : > { %1761 = vmatpush.msra.mxu0 %v1564_v31 }
 0x6f8   : > { %p2337_p12 = pnand %p2336_p11, %p2557_p5  ;;  %p2342_p2 = por %p2341_p1, %p2340_p0 }
 0x6fa   : > { %p2338_p13 = pneg %p2337_p12 }
 0x6fc   : > { %p2343_p3 = pnand %p2342_p2, %p2338_p13 }
 0x74e   : > { %v1768_v33 = vpop.permute.xlu2 %1767 }
 0x74f   : > { %1785 = vmatpush.msra.mxu1 %v1768_v33  ;;  %2211 = vmatpush.xpose.msk.msra.mxu2 %vm814_vm0, %v1768_v33 }
 0x750   : > { %1860 = vmatpush.msra.mxu3 %v1768_v33  ;;  %2214 = vmatpush.xpose.msk.msrb.mxu0 %vm814_vm0, %v1768_v33 }
 0x773   : > { %v1613_v34 = vpop.f32.mrf.mxu0 }
 0x774   : > { %2283 = vtanh.f32 %v1613_v34 }
 0x77a   : > { %v2284_v35 = vpop.eup %2283 }
 0x77b   : > { %2205 = vmatmul.msk.f32.vlgmr.msrb.gmra.mxu1 %vm814_vm0, %v2284_v35 }
 0x77c   : > { %1934 = vmatpush.msrb.mxu1 %v1768_v33 }
 0x783   : > { %2210 = vmatmul.msk.f32.vlgmr.msra.gmra.mxu1 %vm814_vm0, %v1592_v32 }
 0x7f8   : > { %v1640_v36 = vpop.f32.mrf.mxu1 }
 0x7f9   : > { %v1643_v37 = vsel %vm1565_vm12, -1e+20, %v1640_v36 }
 0x7fa   : > { %v1644_v38 = vsel %vm1567_vm13, %v1643_v37, -inf }
 0x7fb   : > { %1645 = vmax.xlane.f32.xlu2 %v1644_v38 }
 0x800   : > { %v1787_v56 = vpop.f32.mrf.mxu1 }
 0x86e   : > { %v1646_v39 = vpop.xlane.xlu2 %1645 }
 0x86f   : > { %v1647_v40 = vsub.f32 %v1643_v37, %v1646_v39 }
 0x871   : > { %v1648_v41 = vmul.f32 1.442695, %v1647_v40 }
 0x873   : > { %2285 = vpow2.f32 %v1648_v41 }
 0x879   : > { %v2286_v42 = vpop.eup %2285 }
 0x87a   : > { %v1650_v5 = vsel %vm1567_vm13, %v2286_v42, 0.0 }
 0x87b   : > { %1651 = vadd.xlane.f32.xlu1 %v1650_v5 }
 0x8ee   : > { %v1652_v43 = vpop.xlane.xlu1 %1651 }
 0x8ef   : > { %2287 = vrcp.f32 %v1652_v43  ;;  %v1664_v48 = vand.u32 2147483648, %v1652_v43  ;;  %v1662_v23 = vand.u32 2147483647, %v1652_v43  ;;  %vm1658_vm8 = vweird.f32 %v1652_v43 }
 0x8f0   : > { %2289 = vtanh.f32 %v1787_v56 }
 0x8f1   : > { %v1665_v52 = vor.u32 1.1754944e-38, %v1664_v48  ;;  %vm1663_vm11 = vcmp.eq.f32.partialorder %v1662_v23, 8.507059e+37 }
 0x8f5   : > { %v2288_v44 = vpop.eup %2287 }
 0x8f6   : > { %v1654_v45 = vmul.f32 %v2288_v44, %v1652_v43  ;;  %vm1659_vm7 = vweird.f32 %v2288_v44  ;;  %v2290_v58 = vpop.eup %2289 }
 0x8f7   : > { %vm1660_vm10 = vmor %vm1658_vm8, %vm1659_vm7 }
 0x8f8   : > { %v1655_v46 = vsub.f32 1.0, %v1654_v45 }
 0x8fa   : > { %v1656_v49 = vmul.f32 %v2288_v44, %v1655_v46 }
 0x8fc   : > { %v1657_v51 = vadd.f32 %v2288_v44, %v1656_v49 }
 0x8fe   : > { %v1661_v53 = vsel %vm1660_vm10, %v2288_v44, %v1657_v51 }
 0x8ff   : > { %v1666_v54 = vsel %vm1663_vm11, %v1665_v52, %v1661_v53 }
 0x900   : > { %v1667_v55 = vmul.f32 %v2286_v42, %v1666_v54 }
 0x902   : > { %v1668_v57 = vmul.f32 %v1667_v55, %v2733_v50 }
 0x904   : > { %2206 = vmatmul.msk.f32.vlgmr.msrb.gmra.mxu2 %vm814_vm0, %v1668_v57 }
 0x90c   : > { %2212 = vmatmul.msk.f32.vlgmr.msra.gmra.mxu2 %vm814_vm0, %v2290_v58 }
 0x987   : > { %v1689_v59 = vpop.f32.mrf.mxu2 }
 0x988   : > { %2291 = vtanh.f32 %v1689_v59 }
 0x98e   : > { %v2292_v6 = vpop.eup %2291 }
 0x98f   : > { %2208 = vmatmul.msk.f32.vlgmr.msrb.gmra.mxu3 %vm814_vm0, %v2292_v6  ;;  %v2775_v60 = vpop.f32.mrf.mxu2 }
 0x990   : > { %v1816_v61 = vsel %vm1565_vm12, -1e+20, %v2775_v60 }
 0x991   : > { %v1817_v62 = vsel %vm1567_vm13, %v1816_v61, -inf }
 0x992   : > { %1818 = vmax.xlane.f32.xlu0 %v1817_v62 }
 0xa05   : > { %v1819_v63 = vpop.xlane.xlu0 %1818 }
 0xa06   : > { %v1820_v0 = vsub.f32 %v1816_v61, %v1819_v63 }
 0xa08   : > { %v1821_v1 = vmul.f32 1.442695, %v1820_v0 }
 0xa0a   : > { %2293 = vpow2.f32 %v1821_v1 }
 0xa10   : > { %v2294_v2 = vpop.eup %2293 }
 0xa11   : > { %v1823_v3 = vsel %vm1567_vm13, %v2294_v2, 0.0 }
 0xa12   : > { %1824 = vadd.xlane.f32.xlu1 %v1823_v3  ;;  %v1713_v4 = vpop.f32.mrf.mxu3 }
 0xa13   : > { %v1716_v9 = vadd.f32 %v1713_v4, %v1640_v36 }
 0xa15   : > { %v1717_v10 = vsel %vm1565_vm12, -1e+20, %v1716_v9 }
 0xa16   : > { %v1718_v11 = vsel %vm1567_vm13, %v1717_v10, -inf }
 0xa17   : > { %1719 = vmax.xlane.f32.xlu0 %v1718_v11 }
 0xa85   : > { %v1825_v7 = vpop.xlane.xlu1 %1824 }
 0xa86   : > { %2295 = vrcp.f32 %v1825_v7  ;;  %v1837_v17 = vand.u32 2147483648, %v1825_v7  ;;  %v1835_v19 = vand.u32 2147483647, %v1825_v7  ;;  %vm1831_vm15 = vweird.f32 %v1825_v7 }
 0xa88   : > { %v1838_v21 = vor.u32 1.1754944e-38, %v1837_v17  ;;  %vm1836_vm2 = vcmp.eq.f32.partialorder %v1835_v19, 8.507059e+37 }
 0xa8a   : > { %v1720_v12 = vpop.xlane.xlu0 %1719 }
 0xa8b   : > { %v1721_v8 = vsub.f32 %v1717_v10, %v1720_v12 }
 0xa8c   : > { %v2296_v13 = vpop.eup %2295 }
 0xa8d   : > { %v1827_v14 = vmul.f32 %v2296_v13, %v1825_v7  ;;  %v1722_v15 = vmul.f32 1.442695, %v1721_v8  ;;  %vm1832_vm14 = vweird.f32 %v2296_v13 }
 0xa8e   : > { %vm1833_vm1 = vmor %vm1831_vm15, %vm1832_vm14 }
 0xa8f   : > { %v1828_v16 = vsub.f32 1.0, %v1827_v14  ;;  %2297 = vpow2.f32 %v1722_v15  ;;  %v1973_v14 = vld [vmem:[%s2894_s19 + $0x8] sm:$0xff]  ;;  %v1972_v15 = vld [vmem:[%s2894_s19] sm:$0xff] }
 0xa90   : > { %1992 = vmatpush.msrb.mxu2 %v1973_v14 }
 0xa91   : > { %v1829_v18 = vmul.f32 %v2296_v13, %v1828_v16 }
 0xa92   : > { %1993 = vmatpush.msrb.mxu2 %v1972_v15 }
 0xa93   : > { %v1830_v20 = vadd.f32 %v2296_v13, %v1829_v18 }
 0xa95   : > { %v2298_v22 = vpop.eup %2297  ;;  %v1834_v24 = vsel %vm1833_vm1, %v2296_v13, %v1830_v20 }
 0xa96   : > { %v1839_v25 = vsel %vm1836_vm2, %v1838_v21, %v1834_v24  ;;  %v1724_v26 = vsel %vm1567_vm13, %v2298_v22, 0.0 }
 0xa97   : > { %v1840_v27 = vmul.f32 %v2294_v2, %v1839_v25  ;;  %1725 = vadd.xlane.f32.xlu1 %v1724_v26  ;;  %v1945_v26 = vld [vmem:[%s2892_s17] sm:$0x1] }
 0xa99   : > { %v1841_v28 = vmul.f32 %v1840_v27, %v2733_v50 }
 0xa9b   : > { %2213 = vmatmul.msk.f32.vlgmr.msra.gmra.mxu3 %vm814_vm0, %v1841_v28 }
 0xb0a   : > { %v1726_v29 = vpop.xlane.xlu1 %1725 }
 0xb0b   : > { %2299 = vrcp.f32 %v1726_v29  ;;  %v1738_v33 = vand.u32 2147483648, %v1726_v29  ;;  %v1736_v35 = vand.u32 2147483647, %v1726_v29  ;;  %vm1732_vm4 = vweird.f32 %v1726_v29 }
 0xb0d   : > { %v1739_v37 = vor.u32 1.1754944e-38, %v1738_v33  ;;  %vm1737_vm6 = vcmp.eq.f32.partialorder %v1736_v35, 8.507059e+37 }
 0xb11   : > { %v2300_v30 = vpop.eup %2299 }
 0xb12   : > { %v1728_v31 = vmul.f32 %v2300_v30, %v1726_v29  ;;  %vm1733_vm3 = vweird.f32 %v2300_v30  ;;  %v1946_v29 = vld [vmem:[%s2893_s18] sm:$0x1] }
 0xb13   : > { %vm1734_vm5 = vmor %vm1732_vm4, %vm1733_vm3  ;;  %vm2050_vm3 = vcmask 16384  }
 0xb14   : > { %v1729_v32 = vsub.f32 1.0, %v1728_v31 }
 0xb16   : > { %v1730_v34 = vmul.f32 %v2300_v30, %v1729_v32  ;;  %v1974_v32 = vld [vmem:[%s2895_s20] sm:$0x1] }
 0xb18   : > { %v1731_v36 = vadd.f32 %v2300_v30, %v1730_v34 }
 0xb1a   : > { %v1735_v38 = vsel %vm1734_vm5, %v2300_v30, %v1731_v36 }
 0xb1b   : > { %v1740_v39 = vsel %vm1737_vm6, %v1739_v37, %v1735_v38 }
 0xb1c   : > { %v1741_v40 = vmul.f32 %v2298_v22, %v1740_v39 }
 0xb1e   : > { %v1862_v41 = vpop.f32.mrf.mxu3  ;;  %v1742_v42 = vmul.f32 %v1741_v40, %v2733_v50 }
 0xb1f   : > { %2301 = vtanh.f32 %v1862_v41  ;;  %v2025_v41 = vld [vmem:[%s2898_s23 + $0x8] sm:$0xff] }
 0xb20   : > { %2209 = vmatmul.msk.f32.vlgmr.msra.gmra.mxu0 %vm814_vm0, %v1742_v42  ;;  %v2024_v42 = vld [vmem:[%s2898_s23] sm:$0xff]  ;;  %2044 = vmatpush.msrb.mxu3 %v2025_v41 }
 0xb22   : > { %2045 = vmatpush.msrb.mxu3 %v2024_v42 }
 0xb25   : > { %v2302_v5 = vpop.eup %2301 }
 0xb28   : > { %2215 = vmatmul.msk.f32.vlgmr.msrb.gmra.mxu0 %vm814_vm0, %v2302_v5 }
 0xb9d   : > { %v1763_v43 = vpop.f32.mrf.mxu0 }
 0xba5   : > { %v1886_v44 = vpop.f32.mrf.mxu0 }
 0xba6   : > { %v1889_v45 = vadd.f32 %v1886_v44, %v2775_v60 }
 0xba8   : > { %v1890_v46 = vsel %vm1565_vm12, -1e+20, %v1889_v45 }
 0xba9   : > { %v1891_v48 = vsel %vm1567_vm13, %v1890_v46, -inf }
 0xbaa   : > { %1892 = vmax.xlane.f32.xlu0 %v1891_v48 }
 0xc1d   : > { %v1893_v49 = vpop.xlane.xlu0 %1892 }
 0xc1e   : > { %v1894_v23 = vsub.f32 %v1890_v46, %v1893_v49 }
 0xc20   : > { %v1895_v51 = vmul.f32 1.442695, %v1894_v23 }
 0xc22   : > { %2303 = vpow2.f32 %v1895_v51 }
 0xc28   : > { %v2304_v52 = vpop.eup %2303 }
 0xc29   : > { %v1897_v53 = vsel %vm1567_vm13, %v2304_v52, 0.0  ;;  %vm1947_vm13 = vcmask 122880  }
 0xc2a   : > { %1898 = vadd.xlane.f32.xlu1 %v1897_v53 }
 0xc9d   : > { %v1899_v54 = vpop.xlane.xlu1 %1898 }
 0xc9e   : > { %2305 = vrcp.f32 %v1899_v54  ;;  %v1911_v58 = vand.u32 2147483648, %v1899_v54  ;;  %v1909_v6 = vand.u32 2147483647, %v1899_v54  ;;  %vm1905_vm12 = vweird.f32 %v1899_v54 }
 0xca0   : > { %v1912_v61 = vor.u32 1.1754944e-38, %v1911_v58  ;;  %vm1910_vm10 = vcmp.eq.f32.partialorder %v1909_v6, 8.507059e+37 }
 0xca4   : > { %v2306_v55 = vpop.eup %2305 }
 0xca5   : > { %v1901_v56 = vmul.f32 %v2306_v55, %v1899_v54  ;;  %vm1906_vm7 = vweird.f32 %v2306_v55 }
 0xca6   : > { %vm1907_vm8 = vmor %vm1905_vm12, %vm1906_vm7 }
 0xca7   : > { %v1902_v57 = vsub.f32 1.0, %v1901_v56 }
 0xca9   : > { %v1903_v59 = vmul.f32 %v2306_v55, %v1902_v57  ;;  %v2026_v57 = vld [vmem:[%s2899_s24] sm:$0x1] }
 0xcab   : > { %v1904_v60 = vadd.f32 %v2306_v55, %v1903_v59 }
 0xcad   : > { %v1908_v62 = vsel %vm1907_vm8, %v2306_v55, %v1904_v60 }
 0xcae   : > { %v1913_v63 = vsel %vm1910_vm10, %v1912_v61, %v1908_v62 }
 0xcaf   : > { %v1914_v0 = vmul.f32 %v2304_v52, %v1913_v63  ;;  %v1998_v52 = vld [vmem:[%s2896_s21] sm:$0x1] }
 0xcb1   : > { %v1915_v1 = vmul.f32 %v1914_v0, %v2733_v50 }
 0xcb3   : > { %2216 = vmatmul.msk.f32.vlgmr.msrb.gmra.mxu1 %vm814_vm0, %v1915_v1 }
 0xd30   : > { %v1936_v2 = vpop.f32.mrf.mxu1 }
 0xd31   : > { %2307 = vtanh.f32 %v1936_v2 }
 0xd32   : > { %2309 = vtanh.f32 %v1763_v43 }
 0xd37   : > { %v2308_v3 = vpop.eup %2307 }
 0xd38   : > { %1941 = vrot.lane.b32.xlu2 %v2308_v3, %s2385_s29  ;;  %v2310_v4 = vpop.eup %2309 }
 0xd92   : > { %v1942_v9 = vpop.permute.xlu2 %1941 }
 0xd93   : > { %v1944_v10 = vsel %vm814_vm0, %v2310_v4, %v1942_v9 }
 0xd94   : > { %v1948_v11 = vsel %vm1947_vm13, %v1944_v10, 0.0 }
 0xd95   : > { %1949 = vadd.xlane.f32.xlu0 %v1948_v11 }
 0xe08   : > { %v1950_v7 = vpop.xlane.xlu0 %1949 }
 0xe09   : > { %v1951_v12 = vmul.f32 %v1950_v7, %v2726_v47 }
 0xe0b   : > { %v1952_v50 = vsub.f32 %v1944_v10, %v1951_v12 }
 0xe0d   : > { %v1953_v8 = vmul.f32 %v1952_v50, %v1952_v50 }
 0xe0f   : > { %v1954_v13 = vsel %vm1947_vm13, %v1953_v8, 0.0 }
 0xe10   : > { %1955 = vadd.xlane.f32.xlu1 %v1954_v13 }
 0xe83   : > { %v1956_v16 = vpop.xlane.xlu1 %1955 }
 0xe84   : > { %v1957_v17 = vmul.f32 %v1956_v16, %v2726_v47 }
 0xe86   : > { %v1958_v18 = vadd.f32 1e-05, %v1957_v17 }
 0xe88   : > { %2311 = vrsqrt.f32 %v1958_v18  ;;  %vm1965_vm11 = vweird.f32 %v1958_v18 }
 0xe8e   : > { %v2312_v19 = vpop.eup %2311 }
 0xe8f   : > { %v1960_v20 = vmul.f32 %v2312_v19, %v1958_v18  ;;  %vm1966_vm0 = vweird.f32 %v2312_v19 }
 0xe90   : > { %vm1967_vm14 = vmor %vm1965_vm11, %vm1966_vm0 }
 0xe91   : > { %v1961_v21 = vmul.f32 %v2312_v19, %v1960_v20 }
 0xe93   : > { %v1962_v22 = vmul.f32 0.5, %v1961_v21 }
 0xe95   : > { %v1963_v24 = vsub.f32 1.5, %v1962_v22 }
 0xe97   : > { %v1964_v25 = vmul.f32 %v2312_v19, %v1963_v24 }
 0xe99   : > { %v1968_v27 = vsel %vm1967_vm14, %v2312_v19, %v1964_v25 }
 0xe9a   : > { %v1969_v28 = vmul.f32 %v1968_v27, %v1952_v50 }
 0xe9c   : > { %v1970_v30 = vmul.f32 %v1969_v28, %v1945_v26 }
 0xe9e   : > { %v1971_v31 = vadd.f32 %v1970_v30, %v1946_v29 }
 0xea0   : > { %2217 = vmatmul.msk.f32.vlgmr.msrb.gmra.mxu2 %vm1459_vm9, %v1971_v31 }
 0xf23   : > { %v1995_v33 = vpop.f32.mrf.mxu2 }
 0xf24   : > { %v1996_v34 = vadd.f32 %v1995_v33, %v1974_v32 }
 0xf26   : > { %v2000_v35 = vsel %vm1947_vm13, %v1996_v34, 0.0 }
 0xf27   : > { %2001 = vadd.xlane.f32.xlu0 %v2000_v35 }
 0xf9a   : > { %v2002_v36 = vpop.xlane.xlu0 %2001 }
 0xf9b   : > { %v2003_v37 = vmul.f32 %v2002_v36, %v2726_v47 }
 0xf9d   : > { %v2004_v38 = vsub.f32 %v1996_v34, %v2003_v37 }
 0xf9f   : > { %v2005_v39 = vmul.f32 %v2004_v38, %v2004_v38 }
 0xfa1   : > { %v2006_v40 = vsel %vm1947_vm13, %v2005_v39, 0.0 }
 0xfa2   : > { %2007 = vadd.xlane.f32.xlu1 %v2006_v40 }
0x1015   : > { %v2008_v5 = vpop.xlane.xlu1 %2007 }
0x1016   : > { %v2009_v43 = vmul.f32 %v2008_v5, %v2726_v47  ;;  %v1999_v47 = vld [vmem:[%s2897_s22] sm:$0x1] }
0x1018   : > { %v2010_v44 = vadd.f32 1e-05, %v2009_v43 }
0x101a   : > { %2313 = vrsqrt.f32 %v2010_v44  ;;  %vm2017_vm1 = vweird.f32 %v2010_v44 }
0x1020   : > { %v2314_v45 = vpop.eup %2313 }
0x1021   : > { %v2012_v46 = vmul.f32 %v2314_v45, %v2010_v44  ;;  %vm2018_vm15 = vweird.f32 %v2314_v45 }
0x1022   : > { %vm2019_vm2 = vmor %vm2017_vm1, %vm2018_vm15 }
0x1023   : > { %v2013_v48 = vmul.f32 %v2314_v45, %v2012_v46 }
0x1025   : > { %v2014_v49 = vmul.f32 0.5, %v2013_v48 }
0x1027   : > { %v2015_v23 = vsub.f32 1.5, %v2014_v49 }
0x1029   : > { %v2016_v51 = vmul.f32 %v2314_v45, %v2015_v23 }
0x102b   : > { %v2020_v53 = vsel %vm2019_vm2, %v2314_v45, %v2016_v51 }
0x102c   : > { %v2021_v54 = vmul.f32 %v2020_v53, %v2004_v38 }
0x102e   : > { %v2022_v55 = vmul.f32 %v2021_v54, %v1998_v52 }
0x1030   : > { %v2023_v56 = vadd.f32 %v2022_v55, %v1999_v47 }
0x1032   : > { %2218 = vmatmul.msk.f32.vlgmr.msrb.gmra.mxu3 %vm1459_vm9, %v2023_v56 }
0x10b5   : > { %v2047_v58 = vpop.f32.mrf.mxu3 }
0x10b6   : > { %v2048_v59 = vadd.f32 %v2047_v58, %v2026_v57 }
0x10b8   : > { %v2051_v6 = vsel %vm2050_vm3, %v2048_v59, -inf }
0x10b9   : > { %2052 = vmax.xlane.f32.xlu0 %v2051_v6 }
0x112c   : > { %v2053_v60 = vpop.xlane.xlu0 %2052 }
0x112d   : > { %v2054_v61 = vsub.f32 %v2048_v59, %v2053_v60 }
0x112f   : > { %v2055_v62 = vmul.f32 1.442695, %v2054_v61 }
0x1131   : > { %2315 = vpow2.f32 %v2055_v62 }
0x1137   : > { %v2316_v63 = vpop.eup %2315 }
0x1138   : > { %v2057_v0 = vsel %vm2050_vm3, %v2316_v63, 0.0 }
0x1139   : > { %2058 = vadd.xlane.f32.xlu1 %v2057_v0 }
0x11ac   : > { %v2059_v1 = vpop.xlane.xlu1 %2058 }
0x11ad   : > { %2317 = vrcp.f32 %v2059_v1  ;;  %v2071_v9 = vand.u32 2147483648, %v2059_v1  ;;  %v2069_v11 = vand.u32 2147483647, %v2059_v1  ;;  %vm2065_vm4 = vweird.f32 %v2059_v1 }
0x11af   : > { %v2072_v12 = vor.u32 1.1754944e-38, %v2071_v9  ;;  %vm2070_vm6 = vcmp.eq.f32.partialorder %v2069_v11, 8.507059e+37 }
0x11b3   : > { %v2318_v2 = vpop.eup %2317 }
0x11b4   : > { %v2061_v3 = vmul.f32 %v2318_v2, %v2059_v1  ;;  %vm2066_vm9 = vweird.f32 %v2318_v2 }
0x11b5   : > { %vm2067_vm5 = vmor %vm2065_vm4, %vm2066_vm9 }
0x11b6   : > { %v2062_v4 = vsub.f32 1.0, %v2061_v3 }
0x11b8   : > { %v2063_v10 = vmul.f32 %v2318_v2, %v2062_v4 }
0x11ba   : > { %v2064_v7 = vadd.f32 %v2318_v2, %v2063_v10 }
0x11bc   : > { %v2068_v50 = vsel %vm2067_vm5, %v2318_v2, %v2064_v7 }
0x11bd   : > { %v2073_v8 = vsel %vm2070_vm6, %v2072_v12, %v2068_v50 }
0x11be   : > { %v2074_v13 = vmul.f32 %v2316_v63, %v2073_v8 }
0x11c0   : > { %2075 = vst.msk [vmem:[%s778_s30] sm:$0x1] %vm2050_vm3, %v2074_v13 }
0x11c1   : > { %2346 = shalt.err (!%p2343_p3)
}
0x11c2   : > { %2221 = dma.vmem_to_hbm [thread:$0]  (%p2557_p5), %s2088_s4, 16, %s2090_s1, %s2077_s5  }
0x11c3 PF: > { %s2951_s9 = sld [smem:[#allocation7_spill]] }
0x11c4   : > { %s2952_s30 = sld [smem:[#allocation5_spill]] }
0x11c9   : > { %p2227_p4 = scmp.ge.s32.totalorder %s2951_s9, 2 }
0x11ca   : > { %s2101_s12 = sand.u32 1, %s2952_s30  }
0x11cb   : > { %p2224_p7 = pnand %p2227_p4, %p2561_p6  ;;  %s2102_s27 = scalar_lea.sflag [#allocation3], %s2101_s12 }
0x11cd   : > { %p2225_p8 = pneg %p2224_p7 }
0x11cf   : > { %2364 = dma.done.wait (%p2225_p8), %s2102_s27, 16  }
0x11d0   : > { %2366 = vsyncadd (%p2225_p8), %s2102_s27, 4294967280  ;;  %s2954_s30 = sld [smem:[#allocation8_spill]]  ;;  %s2957_s29 = smov %s2373_s2 }
0x11d1   : > { %s2955_s10 = sld [smem:[#allocation6_spill]] }
0x11d2   : > { %s2956_s6 = sld [smem:[#allocation9_spill]] }
0x11d6   : > { %p35_p9 = scmp.ge.s32.totalorder %s2954_s30, 4  }
0x11d7   : > { %s2958_s2 = smov %s2955_s10 }
0x11d8   :  { %37 = sbr.rel (!%p35_p9) target bundleno = 17 (0x11), region = 161 }
0x11dd   :  { %2107 = vsyncpa [#allocation3], 1 }
0x11de   :  { %2109 = vsyncpa [#allocation3 + $0x1], 1 }

</bundles_post_ra>
